<compile_context>
chip_gen: v7x
topology: tpu7x:2x2x1
jax: 0.10.0
libtpu: 0.0.40
codegen_flags: <defaults>
</compile_context>

<pallas_src>
import math
import numpy as np
import jax
import jax.numpy as jnp
from jax.experimental import pallas as pl
from jax.experimental.pallas import tpu as pltpu

LARGE_NEG = -1.0e9


def _tpu_generation():
    try:
        kind = jax.devices()[0].device_kind.lower()
    except Exception:
        return 6
    for g in (7, 6, 5, 4):
        if ("v%d" % g) in kind or ("tpu%d" % g) in kind:
            return g
    return 6


# ----------------------------------------------------------------------------
# Kernel 1: one transformer encoder layer + fused classifier-head partials,
# gridded over row blocks.  Each grid step processes (Rb, L, H) rows with all
# weight GEMMs running at M = Rb*L (bf16 operands, f32 accumulation), and
# emits per-block LSE partials for the masked global token softmax.
# ----------------------------------------------------------------------------
def encoder_head_kernel(emb_ref, kbias_ref, hmask_ref, watt_ref,
                        wqkv_ref, wo_ref, w1_ref, b1_ref, w2_ref, b2_ref,
                        g1_ref, bt1_ref, g2_ref, bt2_ref, bdiag_ref,
                        part_ref):
    Rb, L, H = emb_ref.shape
    N = Rb * L
    e2d = emb_ref[...].reshape(N, H)                      # (N, H) f32

    # Fused QKV projection; 1/sqrt(H) already folded into the Q columns.
    qkv = jnp.dot(e2d.astype(jnp.bfloat16), wqkv_ref[...],
                  preferred_element_type=jnp.float32)     # (N, 3H)
    q = qkv[:, :H]
    k = qkv[:, H:2 * H]
    v = qkv[:, 2 * H:]

    # Flattened block-diagonal attention: one (N, N) score matmul; the
    # precomputed block-diagonal bias keeps tokens inside their own row and
    # the precomputed key-padding bias masks padded keys.
    scores = jax.lax.dot_general(
        q.astype(jnp.bfloat16), k.astype(jnp.bfloat16),
        (((1,), (1,)), ((), ())), preferred_element_type=jnp.float32)  # (N, N)
    scores = scores + bdiag_ref[...] + kbias_ref[...].reshape(1, N)
    scores = scores - jnp.max(scores, axis=-1, keepdims=True)
    probs = jnp.exp(scores)
    probs = probs * pl.reciprocal(jnp.sum(probs, axis=-1, keepdims=True),
                                  approx=True)

    ctx = jnp.dot(probs.astype(jnp.bfloat16), v.astype(jnp.bfloat16),
                  preferred_element_type=jnp.float32)     # (N, H)
    attn_out = jnp.dot(ctx.astype(jnp.bfloat16), wo_ref[...],
                       preferred_element_type=jnp.float32)

    def layer_norm(xv, g, b):
        mu = jnp.mean(xv, axis=-1, keepdims=True)
        var = jnp.mean((xv - mu) ** 2, axis=-1, keepdims=True)
        return (xv - mu) * jax.lax.rsqrt(var + 1e-12) * g + b

    h1 = layer_norm(e2d + attn_out, g1_ref[...], bt1_ref[...])
    ff = jnp.dot(h1.astype(jnp.bfloat16), w1_ref[...],
                 preferred_element_type=jnp.float32) + b1_ref[...]
    ff = jax.nn.gelu(ff, approximate=True)
    ff = jnp.dot(ff.astype(jnp.bfloat16), w2_ref[...],
                 preferred_element_type=jnp.float32) + b2_ref[...]
    h2 = layer_norm(h1 + ff, g2_ref[...], bt2_ref[...])   # (N, H) f32

    # ---- fused classifier-head partials, token axis on the lanes ----
    w_att = watt_ref[...].reshape(1, H)                   # view-specific weight
    hm = hmask_ref[...].reshape(1, N)                     # multiplicative mask
    logits = jax.lax.dot_general(w_att, h2, (((1,), (1,)), ((), ())),
                                 preferred_element_type=jnp.float32)  # (1, N)
    logits = logits + (1.0 - hm) * LARGE_NEG
    m_b = jnp.max(logits, axis=-1, keepdims=True)         # (1, 1) block max
    e = jnp.exp(logits - m_b)                             # (1, N)
    s_b = jnp.sum(e, axis=-1, keepdims=True)              # (1, 1) block exp-sum
    num = jnp.dot(e * hm, h2, preferred_element_type=jnp.float32)     # (1, H)

    part = jnp.concatenate(
        [num,
         jnp.broadcast_to(m_b, (1, H)),
         jnp.broadcast_to(s_b, (1, H)),
         jnp.zeros((5, H), jnp.float32)], axis=0)          # (8, H) lane-dense
    part_ref[...] = part.reshape(1, 8, H)


def _const_spec(shape):
    """Grid-invariant operand: request a single VMEM buffer (no dbl-buffer)."""
    idx = lambda r: (0,) * len(shape)
    try:
        return pl.BlockSpec(shape, idx, pipeline_mode=pl.Buffered(1))
    except (TypeError, AttributeError):   # older API: fall back to default
        return pl.BlockSpec(shape, idx)


def encoder_head_partials(emb, attn_bias, head_mask, w_att, bdiag, enc_k,
                          rb, gen):
    n_rows, L, H = emb.shape
    N = rb * L
    n_blocks = n_rows // rb
    F = enc_k["w1"].shape[-1]

    in_specs = [
        pl.BlockSpec((rb, L, H), lambda r: (r, 0, 0)),   # embeddings
        pl.BlockSpec((1, 1, N), lambda r: (r, 0, 0)),    # key-padding bias
        pl.BlockSpec((1, 1, N), lambda r: (r, 0, 0)),    # head mask
        pl.BlockSpec((1, 1, H), lambda r: (r, 0, 0)),    # per-block attn weight
        _const_spec((H, 3 * H)), _const_spec((H, H)),    # wqkv, wo (bf16)
        _const_spec((H, F)), _const_spec((1, F)),        # w1, b1
        _const_spec((F, H)), _const_spec((1, H)),        # w2, b2
        _const_spec((1, H)), _const_spec((1, H)),        # ln1 gamma/beta
        _const_spec((1, H)), _const_spec((1, H)),        # ln2 gamma/beta
        _const_spec((N, N)),                             # block-diagonal bias
    ]
    out_spec = pl.BlockSpec((1, 8, H), lambda r: (r, 0, 0))

    # Explicit VMEM budget: single-buffered weights + double-buffered streamed
    # blocks + in-kernel intermediates, with headroom; capped per generation.
    weight_bytes = (H * 3 * H + H * H + 2 * H * F) * 2 + (6 * H + F) * 4 + N * N * 4
    stream_bytes = 2 * (rb * L * H * 4 + 2 * N * 4 + H * 4 + 8 * H * 4)
    interm_bytes = (3 * N * H + 2 * N * N + 2 * N * H + N * F) * 4
    cap = (56 << 20) if gen >= 7 else (100 << 20)
    vmem_limit = int(min(max(weight_bytes + stream_bytes + interm_bytes
                             + (8 << 20), 32 << 20), cap))

    return pl.pallas_call(
        encoder_head_kernel,
        out_shape=jax.ShapeDtypeStruct((n_blocks, 8, H), jnp.float32),
        grid=(n_blocks,),
        in_specs=in_specs,
        out_specs=out_spec,
        compiler_params=pltpu.CompilerParams(
            dimension_semantics=("parallel",),
            vmem_limit_bytes=vmem_limit),
    )(emb, attn_bias, head_mask, w_att,
      enc_k["wqkv"], enc_k["wo"], enc_k["w1"], enc_k["b1"], enc_k["w2"],
      enc_k["b2"], enc_k["ln1_g"], enc_k["ln1_b"], enc_k["ln2_g"],
      enc_k["ln2_b"], bdiag)


# ----------------------------------------------------------------------------
# Kernel 2: combine the per-block LSE partials of both views (masked global
# softmax pooling) and apply the fused (2H, C) prediction linear.  Only tiny
# (n_blocks, 8, H) partials are read -- no (N, H) hidden slab round trip.
# ----------------------------------------------------------------------------
def head_combine_kernel(px_ref, ps_ref, ptot_ref, wp_ref, bp_ref, out_ref):
    def pool(part):                           # part: (nb, 8, H)
        num = part[:, 0, :]                   # unnormalized weighted sums
        m = part[:, 1, :]                     # block max (lane-broadcast)
        s = part[:, 2, :]                     # block exp-sum (lane-broadcast)
        gmax = jnp.max(m, axis=0, keepdims=True)
        scale = jnp.exp(m - gmax)
        denom = jnp.sum(s * scale, axis=0, keepdims=True)
        pooled = jnp.sum(num * scale, axis=0, keepdims=True)
        return pooled * pl.reciprocal(denom, approx=True)      # (1, H)

    dialog = pool(px_ref[...])
    scene = pool(ps_ref[...])
    scene = jnp.where(ptot_ref[...] == 0.0, jnp.zeros_like(scene), scene)
    state = jnp.concatenate([dialog, scene], axis=-1)           # (1, 2H)
    out_ref[...] = jnp.dot(state, wp_ref[...],
                           preferred_element_type=jnp.float32) + bp_ref[...]


def head_combine(part_x, part_s, p_total, wp, bp):
    C = wp.shape[-1]
    vmem = pl.BlockSpec(memory_space=pltpu.MemorySpace.VMEM)
    return pl.pallas_call(
        head_combine_kernel,
        out_shape=jax.ShapeDtypeStruct((1, C), jnp.float32),
        in_specs=[vmem] * 5,
        out_specs=vmem,
    )(part_x, part_s, p_total, wp, bp)


# ----------------------------------------------------------------------------
# Module wrapper with deterministic synthetic parameters.
# ----------------------------------------------------------------------------
class PallasBertMultiViewMultiDimClassifier:
    def __init__(self, key, *, num_classes=2, hidden_size=128, ff_size=256,
                 vocab_size=64, max_length=8):
        self.hidden_size = hidden_size
        self.num_views = 2
        self.num_classes = num_classes
        self.max_length = max_length
        self._tpu_gen = _tpu_generation()

        ks = jax.random.split(key, 16)
        g = lambda k, shape, s=0.02: jax.random.normal(k, shape, jnp.float32) * s
        H, F = hidden_size, ff_size

        # BERT stand-in parameters (f32 masters, used by the reference).
        self.word_emb = g(ks[0], (vocab_size, H), 0.1)
        self.pos_emb = g(ks[1], (max_length, H), 0.1)
        self.enc = dict(
            wq=g(ks[2], (H, H)), wk=g(ks[3], (H, H)),
            wv=g(ks[4], (H, H)), wo=g(ks[5], (H, H)),
            w1=g(ks[6], (H, F)), b1=jnp.zeros((1, F), jnp.float32),
            w2=g(ks[7], (F, H)), b2=jnp.zeros((1, H), jnp.float32),
            ln1_g=jnp.ones((1, H), jnp.float32), ln1_b=jnp.zeros((1, H), jnp.float32),
            ln2_g=jnp.ones((1, H), jnp.float32), ln2_b=jnp.zeros((1, H), jnp.float32),
        )
        # Kernel operands: fused QKV with 1/sqrt(H) folded into the Q columns,
        # bf16 matmul weights, f32 biases / LN params.
        # TODO(synk): on v7x the GEMM weights could be fp8 (halves resident
        # VMEM, doubles MXU rate) -- needs an accuracy sign-off first.
        scale = 1.0 / math.sqrt(H)
        self.enc_kernel = dict(
            wqkv=jnp.concatenate([self.enc["wq"] * scale, self.enc["wk"],
                                  self.enc["wv"]], axis=1).astype(jnp.bfloat16),
            wo=self.enc["wo"].astype(jnp.bfloat16),
            w1=self.enc["w1"].astype(jnp.bfloat16), b1=self.enc["b1"],
            w2=self.enc["w2"].astype(jnp.bfloat16), b2=self.enc["b2"],
            ln1_g=self.enc["ln1_g"], ln1_b=self.enc["ln1_b"],
            ln2_g=self.enc["ln2_g"], ln2_b=self.enc["ln2_b"],
        )

        # attention_fc_{ie,ns,tf,jp}: Linear(H, 1, bias=False) -> (1, H) each
        self.attention_fcs = g(ks[8], (4, 1, H))
        self.s_attention_fcs = g(ks[9], (4, 1, H))
        # pred_fc_{ie,ns,tf,jp}: Linear(2H, C); stored split (reference) + fused
        self.pred_w_dialog = g(ks[10], (4, H, num_classes))
        self.pred_w_scene = g(ks[11], (4, H, num_classes))
        self.pred_b = g(ks[12], (4, 1, num_classes))
        self.pred_w = jnp.concatenate([self.pred_w_dialog, self.pred_w_scene],
                                      axis=1)                 # (4, 2H, C)

    def forward(self, x, mask_x, s, p, mask_s, dim):
        # NOTE: assumes x.shape[0] != 0 and s.shape[0] != 0 (the PyTorch
        # attentive_bert path requires both views).
        L = x.shape[1]
        H = self.hidden_size
        gen = self._tpu_gen
        m_target = 256 if gen <= 5 else 512          # MXU M per grid step
        Rb = max(1, min(m_target // L, max(x.shape[0], s.shape[0])))

        # Pad each view separately to a multiple of Rb so every grid block is
        # pure-dialog or pure-scene (>= 1 block per view => >= 2 "parallel"
        # blocks total, so v7x's two TensorCores both get work).
        def pad_view(tok, attn_m, head_m):
            R = tok.shape[0]
            nb = pl.cdiv(R, Rb)
            padn = nb * Rb - R
            attn_m = attn_m.astype(jnp.float32)
            head_m = head_m.astype(jnp.float32)
            if padn:
                tok = jnp.pad(tok, ((0, padn), (0, 0)))
                attn_m = jnp.pad(attn_m, ((0, padn), (0, 0)))
                head_m = jnp.pad(head_m, ((0, padn), (0, 0)))
            return tok, attn_m, head_m, nb

        xt, xm, xh, nbx = pad_view(x, mask_x, mask_x)
        st, sm, sh, nbs = pad_view(s, mask_s, p)
        n_blocks = nbx + nbs
        tokens = jnp.concatenate([xt, st], axis=0)            # (n_blocks*Rb, L)
        attn_m = jnp.concatenate([xm, sm], axis=0)
        head_m = jnp.concatenate([xh, sh], axis=0)

        # TODO(synk): fuse this embedding gather into the encoder kernel
        # (scalar-prefetch token ids + DMA gather of word_emb rows from HBM)
        # to avoid materializing emb in HBM and re-reading it.
        emb = (self.word_emb[tokens]
               + self.pos_emb[None, :L, :]).astype(jnp.float32)

        N = Rb * L
        attn_bias = ((1.0 - attn_m) * LARGE_NEG).reshape(n_blocks, 1, N)
        head_mask = head_m.reshape(n_blocks, 1, N)

        wax = self.attention_fcs[dim]                         # (1, H)
        was = self.s_attention_fcs[dim]
        w_att = jnp.concatenate(
            [jnp.broadcast_to(wax[None], (nbx, 1, H)),
             jnp.broadcast_to(was[None], (nbs, 1, H))], axis=0)

        # Block-diagonal additive bias: tokens only attend within their own
        # row (all zeros when Rb == 1, i.e. long sequences).
        row_of = jnp.arange(N, dtype=jnp.int32) // L
        bdiag = jnp.where(row_of[:, None] == row_of[None, :],
                          0.0, LARGE_NEG).astype(jnp.float32)

        partials = encoder_head_partials(emb, attn_bias, head_mask, w_att,
                                         bdiag, self.enc_kernel, Rb, gen)

        p_total = jnp.sum(p.astype(jnp.float32)).reshape(1, 1)
        logits = head_combine(partials[:nbx], partials[nbx:], p_total,
                              self.pred_w[dim], self.pred_b[dim])
        return logits.reshape(self.num_classes)


# ----------------------------------------------------------------------------
# Pure-JAX reference of the same math (for a correctness check).
# ----------------------------------------------------------------------------
def reference_forward(model, x, mask_x, s, p, mask_s, dim):
    enc = model.enc

    def layer_norm(v, g, b):
        mu = v.mean(-1, keepdims=True)
        var = ((v - mu) ** 2).mean(-1, keepdims=True)
        return (v - mu) / jnp.sqrt(var + 1e-12) * g + b

    def bert_ref(tokens, mask):
        L = tokens.shape[1]
        emb = model.word_emb[tokens] + model.pos_emb[None, :L, :]
        m = mask.astype(jnp.float32)

        def one_row(e, mrow):
            q = e @ enc["wq"]; k = e @ enc["wk"]; v = e @ enc["wv"]
            sc = q @ k.T / math.sqrt(e.shape[-1]) + (1.0 - mrow)[None, :] * LARGE_NEG
            pr = jax.nn.softmax(sc, axis=-1)
            a = (pr @ v) @ enc["wo"]
            h1 = layer_norm(e + a, enc["ln1_g"], enc["ln1_b"])
            ff = jax.nn.gelu(h1 @ enc["w1"] + enc["b1"], approximate=True) @ enc["w2"] + enc["b2"]
            return layer_norm(h1 + ff, enc["ln2_g"], enc["ln2_b"])

        return jax.vmap(one_row)(emb, m)

    hiddens = bert_ref(x, mask_x)
    s_hiddens = bert_ref(s, mask_s)
    H = model.hidden_size
    hx = hiddens.reshape(-1, H)
    hs = s_hiddens.reshape(-1, H)
    mx = mask_x.reshape(-1, 1).astype(jnp.float32)
    pm = p.reshape(-1, 1).astype(jnp.float32)

    wax = model.attention_fcs[dim]
    was = model.s_attention_fcs[dim]
    tx = jnp.sum(hx * wax, -1, keepdims=True) + (1.0 - mx) * LARGE_NEG
    px = jax.nn.softmax(tx.reshape(-1)).reshape(-1, 1)
    dialog = jnp.sum(hx * px * mx, axis=0, keepdims=True)

    ts = jnp.sum(hs * was, -1, keepdims=True) + (1.0 - pm) * LARGE_NEG
    ps = jax.nn.softmax(ts.reshape(-1)).reshape(-1, 1)
    ps = jnp.where(jnp.sum(pm) == 0.0, jnp.zeros_like(ps), ps)
    scene = jnp.sum(hs * ps * pm, axis=0, keepdims=True)

    logits = (dialog @ model.pred_w_dialog[dim]
              + scene @ model.pred_w_scene[dim]
              + model.pred_b[dim])
    return logits.reshape(model.num_classes)


if __name__ == "__main__":
    key = jax.random.PRNGKey(0)
    k_model, k_x, k_s = jax.random.split(key, 3)

    R_x, R_s, L, H, FF, VOCAB, C = 2, 2, 8, 128, 256, 64, 2
    model = PallasBertMultiViewMultiDimClassifier(
        k_model, num_classes=C, hidden_size=H, ff_size=FF,
        vocab_size=VOCAB, max_length=L)

    x = jax.random.randint(k_x, (R_x, L), 0, VOCAB, dtype=jnp.int32)
    s = jax.random.randint(k_s, (R_s, L), 0, VOCAB, dtype=jnp.int32)
    mask_x = jnp.array([[1, 1, 1, 1, 1, 1, 0, 0],
                        [1, 1, 1, 1, 0, 0, 0, 0]], dtype=jnp.float32)
    mask_s = jnp.array([[1, 1, 1, 1, 1, 1, 1, 1],
                        [1, 1, 1, 1, 1, 1, 1, 0]], dtype=jnp.float32)
    p = jnp.array([[0, 1, 0, 0, 1, 0, 0, 0],
                   [0, 0, 1, 0, 0, 0, 0, 0]], dtype=jnp.float32)
    dim = 2  # T/F head

    out = model.forward(x, mask_x, s, p, mask_s, dim)
    out = jax.block_until_ready(out)

    ref = reference_forward(model, x, mask_x, s, p, mask_s, dim)
    np.testing.assert_allclose(np.asarray(out), np.asarray(ref), rtol=2e-2, atol=2e-2)
    assert out.shape == (C,) and np.all(np.isfinite(np.asarray(out)))

    print("KERNEL_OK")
</pallas_src>

<mosaic_0001>
module attributes {stable_mosaic.version = 11 : i64} {
  func.func @encoder_head_kernel(%arg0: i32, %arg1: memref<2x8x128xf32, #tpu.memory_space<vmem>>, %arg2: memref<1x1x16xf32, #tpu.memory_space<vmem>>, %arg3: memref<1x1x16xf32, #tpu.memory_space<vmem>>, %arg4: memref<1x1x128xf32, #tpu.memory_space<vmem>>, %arg5: memref<128x384xbf16, #tpu.memory_space<vmem>>, %arg6: memref<128x128xbf16, #tpu.memory_space<vmem>>, %arg7: memref<128x256xbf16, #tpu.memory_space<vmem>>, %arg8: memref<1x256xf32, #tpu.memory_space<vmem>>, %arg9: memref<256x128xbf16, #tpu.memory_space<vmem>>, %arg10: memref<1x128xf32, #tpu.memory_space<vmem>>, %arg11: memref<1x128xf32, #tpu.memory_space<vmem>>, %arg12: memref<1x128xf32, #tpu.memory_space<vmem>>, %arg13: memref<1x128xf32, #tpu.memory_space<vmem>>, %arg14: memref<1x128xf32, #tpu.memory_space<vmem>>, %arg15: memref<16x16xf32, #tpu.memory_space<vmem>>, %arg16: memref<1x8x128xf32, #tpu.memory_space<vmem>>) attributes {dimension_semantics = [#tpu.dimension_semantics<parallel>], iteration_bounds = array<i64: 2>, scalar_prefetch = 0 : i64, scratch_operands = 0 : i64, tpu.core_type = #tpu.core_type<tc>, window_params = [{transform_indices = @transform_0, window_bounds = array<i64: 2, 8, 128>}, {transform_indices = @transform_1, window_bounds = array<i64: 1, 1, 16>}, {transform_indices = @transform_2, window_bounds = array<i64: 1, 1, 16>}, {transform_indices = @transform_3, window_bounds = array<i64: 1, 1, 128>}, {pipeline_mode = #tpu.pipeline_mode<synchronous>, transform_indices = @transform_4, window_bounds = array<i64: 128, 384>}, {pipeline_mode = #tpu.pipeline_mode<synchronous>, transform_indices = @transform_5, window_bounds = array<i64: 128, 128>}, {pipeline_mode = #tpu.pipeline_mode<synchronous>, transform_indices = @transform_6, window_bounds = array<i64: 128, 256>}, {pipeline_mode = #tpu.pipeline_mode<synchronous>, transform_indices = @transform_7, window_bounds = array<i64: 1, 256>}, {pipeline_mode = #tpu.pipeline_mode<synchronous>, transform_indices = @transform_8, window_bounds = array<i64: 256, 128>}, {pipeline_mode = #tpu.pipeline_mode<synchronous>, transform_indices = @transform_9, window_bounds = array<i64: 1, 128>}, {pipeline_mode = #tpu.pipeline_mode<synchronous>, transform_indices = @transform_10, window_bounds = array<i64: 1, 128>}, {pipeline_mode = #tpu.pipeline_mode<synchronous>, transform_indices = @transform_11, window_bounds = array<i64: 1, 128>}, {pipeline_mode = #tpu.pipeline_mode<synchronous>, transform_indices = @transform_12, window_bounds = array<i64: 1, 128>}, {pipeline_mode = #tpu.pipeline_mode<synchronous>, transform_indices = @transform_13, window_bounds = array<i64: 1, 128>}, {pipeline_mode = #tpu.pipeline_mode<synchronous>, transform_indices = @transform_14, window_bounds = array<i64: 16, 16>}, {transform_indices = @transform_15, window_bounds = array<i64: 1, 8, 128>}]} {
    %c0 = arith.constant 0 : index
    %c0_0 = arith.constant 0 : index
    %c0_1 = arith.constant 0 : index
    %0 = vector.load %arg1[%c0, %c0_0, %c0_1] : memref<2x8x128xf32, #tpu.memory_space<vmem>>, vector<2x8x128xf32>
    %1 = vector.shape_cast %0 : vector<2x8x128xf32> to vector<16x128xf32>
    %2 = arith.truncf %1 : vector<16x128xf32> to vector<16x128xbf16>
    %c0_2 = arith.constant 0 : index
    %c0_3 = arith.constant 0 : index
    %3 = vector.load %arg5[%c0_2, %c0_3] : memref<128x384xbf16, #tpu.memory_space<vmem>>, vector<128x384xbf16>
    %cst = arith.constant dense<0.000000e+00> : vector<16x384xf32>
    %4 = tpu.matmul %2, %3, %cst {dimension_numbers = #tpu.dot_dimension_numbers<[1], [0], [0], [1], [0, 0, 1, 1], [], []>} : vector<16x128xbf16>, vector<128x384xbf16>, vector<16x384xf32> -> vector<16x384xf32>
    %5 = vector.extract_strided_slice %4 {offsets = [0, 0], sizes = [16, 128], strides = [1, 1]} : vector<16x384xf32> to vector<16x128xf32>
    %6 = vector.extract_strided_slice %4 {offsets = [0, 128], sizes = [16, 128], strides = [1, 1]} : vector<16x384xf32> to vector<16x128xf32>
    %7 = vector.extract_strided_slice %4 {offsets = [0, 256], sizes = [16, 128], strides = [1, 1]} : vector<16x384xf32> to vector<16x128xf32>
    %8 = arith.truncf %5 : vector<16x128xf32> to vector<16x128xbf16>
    %9 = arith.truncf %6 : vector<16x128xf32> to vector<16x128xbf16>
    %cst_4 = arith.constant dense<0.000000e+00> : vector<16x16xf32>
    %10 = tpu.matmul %8, %9, %cst_4 {dimension_numbers = #tpu.dot_dimension_numbers<[1], [1], [0], [0], [0, 0, 1, 0], [], []>} : vector<16x128xbf16>, vector<16x128xbf16>, vector<16x16xf32> -> vector<16x16xf32>
    %c0_5 = arith.constant 0 : index
    %c0_6 = arith.constant 0 : index
    %11 = vector.load %arg15[%c0_5, %c0_6] : memref<16x16xf32, #tpu.memory_space<vmem>>, vector<16x16xf32>
    %12 = arith.addf %10, %11 : vector<16x16xf32>
    %c0_7 = arith.constant 0 : index
    %c0_8 = arith.constant 0 : index
    %c0_9 = arith.constant 0 : index
    %13 = vector.load %arg2[%c0_7, %c0_8, %c0_9] : memref<1x1x16xf32, #tpu.memory_space<vmem>>, vector<1x1x16xf32>
    %14 = vector.shape_cast %13 : vector<1x1x16xf32> to vector<1x16xf32>
    %15 = vector.broadcast %14 : vector<1x16xf32> to vector<16x16xf32>
    %16 = arith.addf %12, %15 : vector<16x16xf32>
    %cst_10 = arith.constant dense<0xFF800000> : vector<16xf32>
    %17 = vector.multi_reduction <maximumf>, %16, %cst_10 [1] : vector<16x16xf32> to vector<16xf32>
    %18 = vector.shape_cast %17 : vector<16xf32> to vector<16x1xf32>
    %19 = vector.broadcast %18 : vector<16x1xf32> to vector<16x16xf32>
    %20 = arith.subf %16, %19 : vector<16x16xf32>
    %21 = math.exp %20 : vector<16x16xf32>
    %cst_11 = arith.constant dense<0.000000e+00> : vector<16xf32>
    %22 = vector.multi_reduction <add>, %21, %cst_11 [1] : vector<16x16xf32> to vector<16xf32>
    %23 = vector.shape_cast %22 : vector<16xf32> to vector<16x1xf32>
    %24 = tpu.reciprocal %23 {approx = true} : vector<16x1xf32> -> vector<16x1xf32>
    %25 = vector.broadcast %24 : vector<16x1xf32> to vector<16x16xf32>
    %26 = arith.mulf %21, %25 : vector<16x16xf32>
    %27 = arith.truncf %26 : vector<16x16xf32> to vector<16x16xbf16>
    %28 = arith.truncf %7 : vector<16x128xf32> to vector<16x128xbf16>
    %cst_12 = arith.constant dense<0.000000e+00> : vector<16x128xf32>
    %29 = tpu.matmul %27, %28, %cst_12 {dimension_numbers = #tpu.dot_dimension_numbers<[1], [0], [0], [1], [0, 0, 1, 1], [], []>} : vector<16x16xbf16>, vector<16x128xbf16>, vector<16x128xf32> -> vector<16x128xf32>
    %30 = arith.truncf %29 : vector<16x128xf32> to vector<16x128xbf16>
    %c0_13 = arith.constant 0 : index
    %c0_14 = arith.constant 0 : index
    %31 = vector.load %arg6[%c0_13, %c0_14] : memref<128x128xbf16, #tpu.memory_space<vmem>>, vector<128x128xbf16>
    %cst_15 = arith.constant dense<0.000000e+00> : vector<16x128xf32>
    %32 = tpu.matmul %30, %31, %cst_15 {dimension_numbers = #tpu.dot_dimension_numbers<[1], [0], [0], [1], [0, 0, 1, 1], [], []>} : vector<16x128xbf16>, vector<128x128xbf16>, vector<16x128xf32> -> vector<16x128xf32>
    %33 = arith.addf %1, %32 : vector<16x128xf32>
    %c0_16 = arith.constant 0 : index
    %c0_17 = arith.constant 0 : index
    %34 = vector.load %arg11[%c0_16, %c0_17] : memref<1x128xf32, #tpu.memory_space<vmem>>, vector<1x128xf32>
    %c0_18 = arith.constant 0 : index
    %c0_19 = arith.constant 0 : index
    %35 = vector.load %arg12[%c0_18, %c0_19] : memref<1x128xf32, #tpu.memory_space<vmem>>, vector<1x128xf32>
    %cst_20 = arith.constant dense<0.000000e+00> : vector<16xf32>
    %36 = vector.multi_reduction <add>, %33, %cst_20 [1] : vector<16x128xf32> to vector<16xf32>
    %37 = vector.shape_cast %36 : vector<16xf32> to vector<16x1xf32>
    %cst_21 = arith.constant 1.280000e+02 : f32
    %38 = vector.broadcast %cst_21 : f32 to vector<16x1xf32>
    %39 = arith.divf %37, %38 : vector<16x1xf32>
    %40 = vector.broadcast %39 : vector<16x1xf32> to vector<16x128xf32>
    %41 = arith.subf %33, %40 : vector<16x128xf32>
    %42 = arith.mulf %41, %41 : vector<16x128xf32>
    %cst_22 = arith.constant dense<0.000000e+00> : vector<16xf32>
    %43 = vector.multi_reduction <add>, %42, %cst_22 [1] : vector<16x128xf32> to vector<16xf32>
    %44 = vector.shape_cast %43 : vector<16xf32> to vector<16x1xf32>
    %cst_23 = arith.constant 1.280000e+02 : f32
    %45 = vector.broadcast %cst_23 : f32 to vector<16x1xf32>
    %46 = arith.divf %44, %45 : vector<16x1xf32>
    %47 = vector.broadcast %39 : vector<16x1xf32> to vector<16x128xf32>
    %48 = arith.subf %33, %47 : vector<16x128xf32>
    %cst_24 = arith.constant 9.99999996E-13 : f32
    %49 = vector.broadcast %cst_24 : f32 to vector<16x1xf32>
    %50 = arith.addf %46, %49 : vector<16x1xf32>
    %51 = math.rsqrt %50 : vector<16x1xf32>
    %52 = vector.broadcast %51 : vector<16x1xf32> to vector<16x128xf32>
    %53 = arith.mulf %48, %52 : vector<16x128xf32>
    %54 = vector.broadcast %34 : vector<1x128xf32> to vector<16x128xf32>
    %55 = arith.mulf %53, %54 : vector<16x128xf32>
    %56 = vector.broadcast %35 : vector<1x128xf32> to vector<16x128xf32>
    %57 = arith.addf %55, %56 : vector<16x128xf32>
    %58 = arith.truncf %57 : vector<16x128xf32> to vector<16x128xbf16>
    %c0_25 = arith.constant 0 : index
    %c0_26 = arith.constant 0 : index
    %59 = vector.load %arg7[%c0_25, %c0_26] : memref<128x256xbf16, #tpu.memory_space<vmem>>, vector<128x256xbf16>
    %cst_27 = arith.constant dense<0.000000e+00> : vector<16x256xf32>
    %60 = tpu.matmul %58, %59, %cst_27 {dimension_numbers = #tpu.dot_dimension_numbers<[1], [0], [0], [1], [0, 0, 1, 1], [], []>} : vector<16x128xbf16>, vector<128x256xbf16>, vector<16x256xf32> -> vector<16x256xf32>
    %c0_28 = arith.constant 0 : index
    %c0_29 = arith.constant 0 : index
    %61 = vector.load %arg8[%c0_28, %c0_29] : memref<1x256xf32, #tpu.memory_space<vmem>>, vector<1x256xf32>
    %62 = vector.broadcast %61 : vector<1x256xf32> to vector<16x256xf32>
    %63 = arith.addf %60, %62 : vector<16x256xf32>
    %64 = arith.mulf %63, %63 : vector<16x256xf32>
    %65 = arith.mulf %63, %64 : vector<16x256xf32>
    %cst_30 = arith.constant 4.471500e-02 : f32
    %66 = vector.broadcast %cst_30 : f32 to vector<16x256xf32>
    %67 = arith.mulf %66, %65 : vector<16x256xf32>
    %68 = arith.addf %63, %67 : vector<16x256xf32>
    %cst_31 = arith.constant 0.797884583 : f32
    %69 = vector.broadcast %cst_31 : f32 to vector<16x256xf32>
    %70 = arith.mulf %69, %68 : vector<16x256xf32>
    %71 = math.tanh %70 : vector<16x256xf32>
    %cst_32 = arith.constant 1.000000e+00 : f32
    %72 = vector.broadcast %cst_32 : f32 to vector<16x256xf32>
    %73 = arith.addf %72, %71 : vector<16x256xf32>
    %cst_33 = arith.constant 5.000000e-01 : f32
    %74 = vector.broadcast %cst_33 : f32 to vector<16x256xf32>
    %75 = arith.mulf %74, %73 : vector<16x256xf32>
    %76 = arith.mulf %63, %75 : vector<16x256xf32>
    %77 = arith.truncf %76 : vector<16x256xf32> to vector<16x256xbf16>
    %c0_34 = arith.constant 0 : index
    %c0_35 = arith.constant 0 : index
    %78 = vector.load %arg9[%c0_34, %c0_35] : memref<256x128xbf16, #tpu.memory_space<vmem>>, vector<256x128xbf16>
    %cst_36 = arith.constant dense<0.000000e+00> : vector<16x128xf32>
    %79 = tpu.matmul %77, %78, %cst_36 {dimension_numbers = #tpu.dot_dimension_numbers<[1], [0], [0], [1], [0, 0, 1, 1], [], []>} : vector<16x256xbf16>, vector<256x128xbf16>, vector<16x128xf32> -> vector<16x128xf32>
    %c0_37 = arith.constant 0 : index
    %c0_38 = arith.constant 0 : index
    %80 = vector.load %arg10[%c0_37, %c0_38] : memref<1x128xf32, #tpu.memory_space<vmem>>, vector<1x128xf32>
    %81 = vector.broadcast %80 : vector<1x128xf32> to vector<16x128xf32>
    %82 = arith.addf %79, %81 : vector<16x128xf32>
    %83 = arith.addf %57, %82 : vector<16x128xf32>
    %c0_39 = arith.constant 0 : index
    %c0_40 = arith.constant 0 : index
    %84 = vector.load %arg13[%c0_39, %c0_40] : memref<1x128xf32, #tpu.memory_space<vmem>>, vector<1x128xf32>
    %c0_41 = arith.constant 0 : index
    %c0_42 = arith.constant 0 : index
    %85 = vector.load %arg14[%c0_41, %c0_42] : memref<1x128xf32, #tpu.memory_space<vmem>>, vector<1x128xf32>
    %cst_43 = arith.constant dense<0.000000e+00> : vector<16xf32>
    %86 = vector.multi_reduction <add>, %83, %cst_43 [1] : vector<16x128xf32> to vector<16xf32>
    %87 = vector.shape_cast %86 : vector<16xf32> to vector<16x1xf32>
    %cst_44 = arith.constant 1.280000e+02 : f32
    %88 = vector.broadcast %cst_44 : f32 to vector<16x1xf32>
    %89 = arith.divf %87, %88 : vector<16x1xf32>
    %90 = vector.broadcast %89 : vector<16x1xf32> to vector<16x128xf32>
    %91 = arith.subf %83, %90 : vector<16x128xf32>
    %92 = arith.mulf %91, %91 : vector<16x128xf32>
    %cst_45 = arith.constant dense<0.000000e+00> : vector<16xf32>
    %93 = vector.multi_reduction <add>, %92, %cst_45 [1] : vector<16x128xf32> to vector<16xf32>
    %94 = vector.shape_cast %93 : vector<16xf32> to vector<16x1xf32>
    %cst_46 = arith.constant 1.280000e+02 : f32
    %95 = vector.broadcast %cst_46 : f32 to vector<16x1xf32>
    %96 = arith.divf %94, %95 : vector<16x1xf32>
    %97 = vector.broadcast %89 : vector<16x1xf32> to vector<16x128xf32>
    %98 = arith.subf %83, %97 : vector<16x128xf32>
    %cst_47 = arith.constant 9.99999996E-13 : f32
    %99 = vector.broadcast %cst_47 : f32 to vector<16x1xf32>
    %100 = arith.addf %96, %99 : vector<16x1xf32>
    %101 = math.rsqrt %100 : vector<16x1xf32>
    %102 = vector.broadcast %101 : vector<16x1xf32> to vector<16x128xf32>
    %103 = arith.mulf %98, %102 : vector<16x128xf32>
    %104 = vector.broadcast %84 : vector<1x128xf32> to vector<16x128xf32>
    %105 = arith.mulf %103, %104 : vector<16x128xf32>
    %106 = vector.broadcast %85 : vector<1x128xf32> to vector<16x128xf32>
    %107 = arith.addf %105, %106 : vector<16x128xf32>
    %c0_48 = arith.constant 0 : index
    %c0_49 = arith.constant 0 : index
    %c0_50 = arith.constant 0 : index
    %108 = vector.load %arg4[%c0_48, %c0_49, %c0_50] : memref<1x1x128xf32, #tpu.memory_space<vmem>>, vector<1x1x128xf32>
    %109 = vector.shape_cast %108 : vector<1x1x128xf32> to vector<1x128xf32>
    %c0_51 = arith.constant 0 : index
    %c0_52 = arith.constant 0 : index
    %c0_53 = arith.constant 0 : index
    %110 = vector.load %arg3[%c0_51, %c0_52, %c0_53] : memref<1x1x16xf32, #tpu.memory_space<vmem>>, vector<1x1x16xf32>
    %111 = vector.shape_cast %110 : vector<1x1x16xf32> to vector<1x16xf32>
    %cst_54 = arith.constant dense<0.000000e+00> : vector<1x16xf32>
    %112 = tpu.matmul %109, %107, %cst_54 {dimension_numbers = #tpu.dot_dimension_numbers<[1], [1], [0], [0], [0, 0, 1, 0], [], []>} : vector<1x128xf32>, vector<16x128xf32>, vector<1x16xf32> -> vector<1x16xf32>
    %cst_55 = arith.constant 1.000000e+00 : f32
    %113 = vector.broadcast %cst_55 : f32 to vector<1x16xf32>
    %114 = arith.subf %113, %111 : vector<1x16xf32>
    %cst_56 = arith.constant -1.000000e+09 : f32
    %115 = vector.broadcast %cst_56 : f32 to vector<1x16xf32>
    %116 = arith.mulf %114, %115 : vector<1x16xf32>
    %117 = arith.addf %112, %116 : vector<1x16xf32>
    %cst_57 = arith.constant dense<0xFF800000> : vector<1xf32>
    %118 = vector.multi_reduction <maximumf>, %117, %cst_57 [1] : vector<1x16xf32> to vector<1xf32>
    %119 = vector.shape_cast %118 : vector<1xf32> to vector<1x1xf32>
    %120 = vector.broadcast %119 : vector<1x1xf32> to vector<1x16xf32>
    %121 = arith.subf %117, %120 : vector<1x16xf32>
    %122 = math.exp %121 : vector<1x16xf32>
    %cst_58 = arith.constant dense<0.000000e+00> : vector<1xf32>
    %123 = vector.multi_reduction <add>, %122, %cst_58 [1] : vector<1x16xf32> to vector<1xf32>
    %124 = vector.shape_cast %123 : vector<1xf32> to vector<1x1xf32>
    %125 = arith.mulf %122, %111 : vector<1x16xf32>
    %cst_59 = arith.constant dense<0.000000e+00> : vector<1x128xf32>
    %126 = tpu.matmul %125, %107, %cst_59 {dimension_numbers = #tpu.dot_dimension_numbers<[1], [0], [0], [1], [0, 0, 1, 1], [], []>} : vector<1x16xf32>, vector<16x128xf32>, vector<1x128xf32> -> vector<1x128xf32>
    %127 = vector.shape_cast %119 : vector<1x1xf32> to vector<1x1xf32>
    %128 = vector.broadcast %127 : vector<1x1xf32> to vector<1x128xf32>
    %129 = vector.shape_cast %124 : vector<1x1xf32> to vector<1x1xf32>
    %130 = vector.broadcast %129 : vector<1x1xf32> to vector<1x128xf32>
    %cst_60 = arith.constant 0.000000e+00 : f32
    %131 = vector.broadcast %cst_60 : f32 to vector<5x128xf32>
    %132 = tpu.concatenate %126, %128, %130, %131 in 0 : vector<1x128xf32>, vector<1x128xf32>, vector<1x128xf32>, vector<5x128xf32> -> vector<8x128xf32>
    %133 = vector.shape_cast %132 : vector<8x128xf32> to vector<1x8x128xf32>
    %c0_61 = arith.constant 0 : index
    %c0_62 = arith.constant 0 : index
    %c0_63 = arith.constant 0 : index
    %134 = vector.load %arg16[%c0_61, %c0_62, %c0_63] : memref<1x8x128xf32, #tpu.memory_space<vmem>>, vector<1x8x128xf32>
    tpu.vector_store %arg16[%c0_61, %c0_62, %c0_63], %133 {strides = array<i32>} : memref<1x8x128xf32, #tpu.memory_space<vmem>>, vector<1x8x128xf32>,
    return
  }
  func.func @transform_0(%arg0: i32) -> (i32, i32, i32) {
    %c0_i32 = arith.constant 0 : i32
    %c0_i32_0 = arith.constant 0 : i32
    %c0_i32_1 = arith.constant 0 : i32
    return %arg0, %c0_i32, %c0_i32_0 : i32, i32, i32
  }
  func.func @transform_1(%arg0: i32) -> (i32, i32, i32) {
    %c0_i32 = arith.constant 0 : i32
    %c0_i32_0 = arith.constant 0 : i32
    %c0_i32_1 = arith.constant 0 : i32
    return %arg0, %c0_i32, %c0_i32_0 : i32, i32, i32
  }
  func.func @transform_2(%arg0: i32) -> (i32, i32, i32) {
    %c0_i32 = arith.constant 0 : i32
    %c0_i32_0 = arith.constant 0 : i32
    %c0_i32_1 = arith.constant 0 : i32
    return %arg0, %c0_i32, %c0_i32_0 : i32, i32, i32
  }
  func.func @transform_3(%arg0: i32) -> (i32, i32, i32) {
    %c0_i32 = arith.constant 0 : i32
    %c0_i32_0 = arith.constant 0 : i32
    %c0_i32_1 = arith.constant 0 : i32
    return %arg0, %c0_i32, %c0_i32_0 : i32, i32, i32
  }
  func.func @transform_4(%arg0: i32) -> (i32, i32) {
    %c0_i32 = arith.constant 0 : i32
    %c0_i32_0 = arith.constant 0 : i32
    %c0_i32_1 = arith.constant 0 : i32
    return %c0_i32, %c0_i32_0 : i32, i32
  }
  func.func @transform_5(%arg0: i32) -> (i32, i32) {
    %c0_i32 = arith.constant 0 : i32
    %c0_i32_0 = arith.constant 0 : i32
    %c0_i32_1 = arith.constant 0 : i32
    return %c0_i32, %c0_i32_0 : i32, i32
  }
  func.func @transform_6(%arg0: i32) -> (i32, i32) {
    %c0_i32 = arith.constant 0 : i32
    %c0_i32_0 = arith.constant 0 : i32
    %c0_i32_1 = arith.constant 0 : i32
    return %c0_i32, %c0_i32_0 : i32, i32
  }
  func.func @transform_7(%arg0: i32) -> (i32, i32) {
    %c0_i32 = arith.constant 0 : i32
    %c0_i32_0 = arith.constant 0 : i32
    %c0_i32_1 = arith.constant 0 : i32
    return %c0_i32, %c0_i32_0 : i32, i32
  }
  func.func @transform_8(%arg0: i32) -> (i32, i32) {
    %c0_i32 = arith.constant 0 : i32
    %c0_i32_0 = arith.constant 0 : i32
    %c0_i32_1 = arith.constant 0 : i32
    return %c0_i32, %c0_i32_0 : i32, i32
  }
  func.func @transform_9(%arg0: i32) -> (i32, i32) {
    %c0_i32 = arith.constant 0 : i32
    %c0_i32_0 = arith.constant 0 : i32
    %c0_i32_1 = arith.constant 0 : i32
    return %c0_i32, %c0_i32_0 : i32, i32
  }
  func.func @transform_10(%arg0: i32) -> (i32, i32) {
    %c0_i32 = arith.constant 0 : i32
    %c0_i32_0 = arith.constant 0 : i32
    %c0_i32_1 = arith.constant 0 : i32
    return %c0_i32, %c0_i32_0 : i32, i32
  }
  func.func @transform_11(%arg0: i32) -> (i32, i32) {
    %c0_i32 = arith.constant 0 : i32
    %c0_i32_0 = arith.constant 0 : i32
    %c0_i32_1 = arith.constant 0 : i32
    return %c0_i32, %c0_i32_0 : i32, i32
  }
  func.func @transform_12(%arg0: i32) -> (i32, i32) {
    %c0_i32 = arith.constant 0 : i32
    %c0_i32_0 = arith.constant 0 : i32
    %c0_i32_1 = arith.constant 0 : i32
    return %c0_i32, %c0_i32_0 : i32, i32
  }
  func.func @transform_13(%arg0: i32) -> (i32, i32) {
    %c0_i32 = arith.constant 0 : i32
    %c0_i32_0 = arith.constant 0 : i32
    %c0_i32_1 = arith.constant 0 : i32
    return %c0_i32, %c0_i32_0 : i32, i32
  }
  func.func @transform_14(%arg0: i32) -> (i32, i32) {
    %c0_i32 = arith.constant 0 : i32
    %c0_i32_0 = arith.constant 0 : i32
    %c0_i32_1 = arith.constant 0 : i32
    return %c0_i32, %c0_i32_0 : i32, i32
  }
  func.func @transform_15(%arg0: i32) -> (i32, i32, i32) {
    %c0_i32 = arith.constant 0 : i32
    %c0_i32_0 = arith.constant 0 : i32
    %c0_i32_1 = arith.constant 0 : i32
    return %arg0, %c0_i32, %c0_i32_0 : i32, i32, i32
  }
}

</mosaic_0001>

<bundles_post_ra>
// kernel: tpu_custom_call.1
= control target key start
LH: loop header
LB: loop body
LE: loop exit
PB: predicated region body
PF: predicated region fallthrough
CT: control target
= control target key end

     0   :  { %s2972_s0 = inlined_call_operand.hbm [shape: f32[4,8,128], index: 0, kind: input, shape index: {}]   ;;  %s2973_s1 = inlined_call_operand.vmem [shape: f32[2,1,16], index: 1, kind: input, shape index: {}]   ;;  %s2974_s2 = inlined_call_operand.vmem [shape: f32[2,1,16], index: 2, kind: input, shape index: {}]   ;;  %s2975_s3 = inlined_call_operand.vmem [shape: f32[2,1,128], index: 3, kind: input, shape index: {}]   ;;  %s2976_s4 = inlined_call_operand.hbm [shape: bf16[128,384], index: 4, kind: input, shape index: {}]   ;;  %s2977_s5 = inlined_call_operand.hbm [shape: bf16[128,128], index: 5, kind: input, shape index: {}]   ;;  %s2978_s6 = inlined_call_operand.hbm [shape: bf16[128,256], index: 6, kind: input, shape index: {}]   ;;  %s2979_s7 = inlined_call_operand.vmem [shape: f32[1,256], index: 7, kind: input, shape index: {}]   ;;  %s2980_s8 = inlined_call_operand.hbm [shape: bf16[256,128], index: 8, kind: input, shape index: {}]   ;;  %s2981_s9 = inlined_call_operand.vmem [shape: f32[1,128], index: 9, kind: input, shape index: {}]   ;;  %s2982_s10 = inlined_call_operand.vmem [shape: f32[1,128], index: 10, kind: input, shape index: {}]   ;;  %s2983_s11 = inlined_call_operand.vmem [shape: f32[1,128], index: 11, kind: input, shape index: {}]   ;;  %s2984_s12 = inlined_call_operand.vmem [shape: f32[1,128], index: 12, kind: input, shape index: {}]   ;;  %s2985_s13 = inlined_call_operand.vmem [shape: f32[1,128], index: 13, kind: input, shape index: {}]   ;;  %s2986_s14 = inlined_call_operand.vmem [shape: f32[16,16], index: 14, kind: input, shape index: {}]   ;;  %s2987_s15 = inlined_call_operand.hbm [shape: f32[2,8,128], index: 15, kind: output, shape index: {}]  }
   0x1   :  { %2996 = sst [smem:[#allocation18_spill]] %s2974_s2 }
   0x2   :  { %2997 = sst [smem:[#allocation19_spill]] %s2975_s3 }
   0x3   :  { %2998 = sst [smem:[#allocation20_spill]] %s2976_s4 }
   0x4   :  { %2999 = sst [smem:[#allocation21_spill]] %s2981_s9 }
   0x5   :  { %3000 = sst [smem:[#allocation22_spill]] %s2984_s12 }
   0x6   :  { %3001 = sst [smem:[#allocation23_spill]] %s2985_s13 }
   0x7   :  { %3002 = sst [smem:[#allocation24_spill]] %s2987_s15 }
   0x8   :  { %20 = vsyncpa [#allocation3], 0 }
   0x9   :  { %22 = vsyncpa [#allocation3 + $0x1], 0 }
   0xa   :  { %23 = vsyncpa [#allocation6], 0 }
   0xb   :  { %24 = vsyncpa [#allocation9], 0 }
   0xc   :  { %25 = vsyncpa [#allocation4], 0 }
   0xd   :  { %27 = vsyncpa [#allocation4 + $0x1], 0  ;;  %s2595_s18 = smov 0   ;;  %s2597_s19 = smov 0  }
   0xe   :  { %s2599_s20 = smov 0   ;;  %s2601_s21 = smov 0  }
   0xf LB: > { %3003 = sst [smem:[#allocation16_spill]] %s2485_s18  ;;  %s2616_s22 = sadd.s32 4294967295, %s2497_s21   ;;  %s2497_s21 = sphi %s2601_s21, %s3035_s21   ;;  %s2493_s20 = sphi %s2599_s20, %s3034_s20   ;;  %s2489_s19 = sphi %s2597_s19, %s3033_s19   ;;  %s2485_s18 = sphi %s2595_s18, %s3032_s18  }
  0x10   : > { %s1862_s23 = sadd.s32 4294967294, %s2497_s21   ;;  %p53_p0 = scmp.ne.s32.totalorder %s2489_s19, %s2485_s18 }
  0x11   : > { %p2991_p1 = scmp.eq.s32.totalorder %s2616_s22, 0  ;;  %p392_p3 = scmp.eq.s32.totalorder %s1862_s23, 1 }
  0x12   : > { %p1863_p5 = scmp.ge.s32.totalorder %s2497_s21, 1  ;;  %p399_p7 = scmp.lt.s32.totalorder %s2497_s21, 3 }
  0x13   : > { %p2625_p4 = por %p2991_p1, %p53_p0  ;;  %p2630_p6 = por %p392_p3, %p53_p0 }
  0x14   : > { %p2635_p8 = pnand %p1863_p5, %p399_p7  ;;  %s2499_s27 = smov [#allocation5]  }
  0x15   : > { %s3004_s24 = scalar_select %p2625_p4, 1, 0 }
  0x16   : > { %s3005_s25 = scalar_select %p2630_p6, 1, 0 }
  0x17   : > { %s3007_s26 = scalar_select %p2635_p8, 1, 0 }
  0x18   : > { %3006 = sst [smem:[#allocation17_spill]] %s3005_s25  ;;  %s411_s28 = sshll.u32 %s2499_s27, 4  ;;  %s2639_s28 = int_to_ptr.vmem [resolvable:$true] %s411_s28 }
  0x19   : > { %p2098_p9 = pneg %p2635_p8  ;;  %s2500_s30 = smov [#allocation8]  }
  0x1a   : > { %s437_s16 = sshll.u32 %s2500_s30, 4  ;;  %s3009_s4 = sld [smem:[#allocation20_spill]]  ;;  %s2650_s16 = int_to_ptr.vmem [resolvable:$true] %s437_s16 }
  0x1b   : > { %p2646_p11 = pnand %p2098_p9, %p2991_p1 }
  0x1d   : > { %p2660_p13 = pneg %p2646_p11 }
  0x20   : > { %s2281_s25 = scalar_lea.hbm %s3009_s4, 3072 }
  0x21   : > { %p2282_p12 = scmp.ne.s32.totalorder %s3009_s4, %s2281_s25  ;;  %p2288_p5 = scmp.lt.u32.totalorder %s2281_s25, %s3009_s4 }
  0x23   : > { %p2284_p0 = pnand %p2660_p13, %p2282_p12 }
  0x25   : > { %p2285_p3 = pneg %p2284_p0 }
  0x27   : > { %p2290_p7 = pnand %p2288_p5, %p2285_p3 }
  0x29   : > { %2293 = shalt.err (!%p2290_p7)
}
  0x2a   : > { %s2294_s18 = scalar_lea.vmem %s2639_s28, 3072  ;;  %p2302_p2 = scmp.lt.s32.totalorder %s2639_s28, %s2639_s28 }
  0x2b   : > { %p2295_p9 = scmp.ne.s32.totalorder %s2639_s28, %s2294_s18  ;;  %p2303_p6 = scmp.lt.s32.totalorder %s2294_s18, %s2294_s18 }
  0x2d   : > { %p2297_p10 = pnand %p2295_p9, %p2660_p13  ;;  %p2304_p12 = por %p2303_p6, %p2302_p2 }
  0x2f   : > { %p2298_p1 = pneg %p2297_p10 }
  0x31   : > { %p2305_p0 = pnand %p2304_p12, %p2298_p1 }
  0x33   : > { %2308 = shalt.err (!%p2305_p0)
}
  0x34   : > { %s2501_s17 = smov 192   ;;  %s2502_s2 = smov 12  }
  0x35   : > { %2101 = dma.hbm_to_vmem [thread:$0]  (!%p2646_p11), %s3009_s4, 3072, %s2639_s28, [#allocation6], %s2501_s17, %s2501_s17, %s2502_s2  }
  0x36   : > { %s2309_s3 = scalar_lea.hbm %s2978_s6, 2048 }
  0x37   : > { %p2310_p2 = scmp.ne.s32.totalorder %s2978_s6, %s2309_s3  ;;  %p2316_p10 = scmp.lt.u32.totalorder %s2309_s3, %s2978_s6 }
  0x39   : > { %p2312_p1 = pnand %p2310_p2, %p2660_p13 }
  0x3b   : > { %p2313_p6 = pneg %p2312_p1 }
  0x3d   : > { %p2318_p3 = pnand %p2316_p10, %p2313_p6 }
  0x3f   : > { %2321 = shalt.err (!%p2318_p3)
}
  0x40   : > { %s2322_s28 = scalar_lea.vmem %s2650_s16, 2048  ;;  %p2330_p12 = scmp.lt.s32.totalorder %s2650_s16, %s2650_s16 }
  0x41   : > { %p2323_p5 = scmp.ne.s32.totalorder %s2650_s16, %s2322_s28  ;;  %p2331_p0 = scmp.lt.s32.totalorder %s2322_s28, %s2322_s28 }
  0x43   : > { %p2325_p7 = pnand %p2323_p5, %p2660_p13  ;;  %p2332_p2 = por %p2331_p0, %p2330_p12 }
  0x45   : > { %p2326_p9 = pneg %p2325_p7 }
  0x47   : > { %p2333_p1 = pnand %p2332_p2, %p2326_p9 }
  0x49   : > { %2336 = shalt.err (!%p2333_p1)
}
  0x4a   : > { %s2994_s12 = smov 128   ;;  %s2995_s3 = smov 8  }
  0x4b   : > { %2107 = dma.hbm_to_vmem [thread:$0]  (!%p2646_p11), %s2978_s6, 2048, %s2650_s16, [#allocation9], %s2994_s12, %s2994_s12, %s2995_s3  }
  0x4c   : > { %s2505_s17 = smov [#allocation7]   ;;  %s2337_s27 = scalar_lea.hbm %s2977_s5, 1024 }
  0x4d   : > { %s424_s2 = sshll.u32 %s2505_s17, 4  ;;  %p2338_p6 = scmp.ne.s32.totalorder %s2977_s5, %s2337_s27  ;;  %s425_s2 = int_to_ptr.vmem [resolvable:$true] %s424_s2 }
  0x4e   : > { %p2344_p5 = scmp.lt.u32.totalorder %s2337_s27, %s2977_s5 }
  0x4f   : > { %p2340_p10 = pnand %p2338_p6, %p2660_p13 }
  0x51   : > { %p2341_p3 = pneg %p2340_p10 }
  0x53   : > { %p2346_p7 = pnand %p2344_p5, %p2341_p3 }
  0x55   : > { %2349 = shalt.err (!%p2346_p7)
}
  0x56   : > { %s2350_s16 = scalar_lea.vmem %s425_s2, 1024  ;;  %p2358_p2 = scmp.lt.s32.totalorder %s425_s2, %s425_s2 }
  0x57   : > { %p2351_p9 = scmp.ne.s32.totalorder %s425_s2, %s2350_s16  ;;  %p2359_p1 = scmp.lt.s32.totalorder %s2350_s16, %s2350_s16 }
  0x59   : > { %p2353_p12 = pnand %p2351_p9, %p2660_p13  ;;  %p2360_p4 = por %p2359_p1, %p2358_p2 }
  0x5b   : > { %p2354_p0 = pneg %p2353_p12 }
  0x5d   : > { %p2361_p8 = pnand %p2360_p4, %p2354_p0 }
  0x5f   : > { %2364 = shalt.err (!%p2361_p8)
}
  0x60   : > { %s2506_s9 = smov 64   ;;  %s2507_s13 = smov 4  }
  0x61   : > { %2104 = dma.hbm_to_vmem [thread:$0]  (!%p2646_p11), %s2977_s5, 1024, %s425_s2, [#allocation6], %s2506_s9, %s2506_s9, %s2507_s13  }
  0x62   : > { %s2508_s25 = smov [#allocation10]   ;;  %s2365_s18 = scalar_lea.hbm %s2980_s8, 2048 }
  0x63   : > { %s453_s23 = sshll.u32 %s2508_s25, 4  ;;  %p2366_p4 = scmp.ne.s32.totalorder %s2980_s8, %s2365_s18  ;;  %s454_s23 = int_to_ptr.vmem [resolvable:$true] %s453_s23 }
  0x64   : > { %p2372_p10 = scmp.lt.u32.totalorder %s2365_s18, %s2980_s8 }
  0x65   : > { %p2368_p8 = pnand %p2366_p4, %p2660_p13 }
  0x67   : > { %p2369_p6 = pneg %p2368_p8 }
  0x69   : > { %p2374_p3 = pnand %p2372_p10, %p2369_p6 }
  0x6b   : > { %2377 = shalt.err (!%p2374_p3)
}
  0x6c   : > { %s2378_s2 = scalar_lea.vmem %s454_s23, 2048  ;;  %p2386_p12 = scmp.lt.s32.totalorder %s454_s23, %s454_s23 }
  0x6d   : > { %p2379_p5 = scmp.ne.s32.totalorder %s454_s23, %s2378_s2  ;;  %p2387_p0 = scmp.lt.s32.totalorder %s2378_s2, %s2378_s2 }
  0x6f   : > { %p2381_p7 = pnand %p2379_p5, %p2660_p13  ;;  %p2388_p2 = por %p2387_p0, %p2386_p12 }
  0x71   : > { %p2382_p9 = pneg %p2381_p7 }
  0x73   : > { %p2389_p1 = pnand %p2388_p2, %p2382_p9 }
  0x75   : > { %2392 = shalt.err (!%p2389_p1)
}
  0x76   : > { %2110 = dma.hbm_to_vmem [thread:$0]  (!%p2646_p11), %s2980_s8, 2048, %s454_s23, [#allocation9], %s2506_s9, %s2506_s9, %s2507_s13  }
  0x77   : > { %s2744_s15 = sadd.s32 1, %s2497_s21   ;;  %s40_s12 = sadd.s32 1, %s2493_s20 }
  0x78   : > { %s37_s29 = ssub.s32 %s2497_s21, %s2744_s15  ;;  %p47_p13 = scmp.ne.s32.totalorder %s2493_s20, %s2489_s19 }
  0x79   : > { %p38_p4 = scmp.eq.s32.totalorder %s37_s29, 0  ;;  %p48_p8 = scmp.eq.s32.totalorder %s2497_s21, 0 }
  0x7a   : > { %p3011_p6 = scmp.eq.s32.totalorder %s2616_s22, 1  ;;  %p2123_p3 = scmp.lt.s32.totalorder %s2497_s21, 2 }
  0x7b   : > { %s2760_s25 = scalar_select %p38_p4, %s2493_s20, %s40_s12  }
  0x7c   : > { %p2754_p10 = por %p3011_p6, %p47_p13  ;;  %p49_p5 = por %p48_p8, %p47_p13 }
  0x7d   : > { %s485_s27 = sand.u32 1, %s2493_s20   ;;  %s1955_s9 = sshll.u32 %s2497_s21, 8 }
  0x7e   : > { %s1869_s30 = sshll.u32 %s485_s27, 4  ;;  %s2767_s18 = scalar_lea.hbm %s2972_s0, %s1955_s9 }
  0x7f   : > { %s489_s28 = scalar_lea.vmem [#allocation2], %s1869_s30  ;;  %p2771_p11 = pnand %p2123_p3, %p49_p5 }
  0x80   : > { %s496_s16 = sshll.u32 %s489_s28, 4  ;;  %s2775_s4 = scalar_lea.sflag [#allocation3], %s485_s27  ;;  %s2769_s16 = int_to_ptr.vmem [resolvable:$true] %s496_s16 }
  0x81   : > { %s2393_s17 = scalar_lea.hbm %s2767_s18, 256  ;;  %p2395_p9 = pneg %p2771_p11 }
  0x82   : > { %p2394_p7 = scmp.ne.s32.totalorder %s2767_s18, %s2393_s17  ;;  %s2398_s30 = scalar_lea.hbm %s2972_s0, 512 }
  0x83   : > { %p2399_p2 = scmp.lt.u32.totalorder %s2767_s18, %s2972_s0  ;;  %p2400_p1 = scmp.lt.u32.totalorder %s2398_s30, %s2393_s17 }
  0x84   : > { %p2396_p12 = pnand %p2395_p9, %p2394_p7  ;;  %p2402_p4 = scmp.lt.u32.totalorder %s2393_s17, %s2767_s18 }
  0x85   : > { %p2401_p13 = por %p2400_p1, %p2399_p2 }
  0x86   : > { %p2397_p0 = pneg %p2396_p12 }
  0x87   : > { %p2403_p8 = por %p2402_p4, %p2401_p13 }
  0x89   : > { %p2404_p6 = pnand %p2403_p8, %p2397_p0 }
  0x8b   : > { %2407 = shalt.err (!%p2404_p6)
}
  0x8c   : > { %s2408_s27 = scalar_lea.vmem %s2769_s16, 256  ;;  %s2509_s23 = smov [#allocation2]  }
  0x8d   : > { %p2409_p3 = scmp.ne.s32.totalorder %s2769_s16, %s2408_s27  ;;  %s2413_s28 = sshll.u32 %s2509_s23, 4  ;;  %s2414_s28 = int_to_ptr.vmem [resolvable:$false] %s2413_s28 }
  0x8e   : > { %s2415_s12 = scalar_lea.vmem %s2414_s28, 512  ;;  %p2416_p12 = scmp.lt.s32.totalorder %s2769_s16, %s2414_s28 }
  0x8f   : > { %p2411_p5 = pnand %p2409_p3, %p2395_p9  ;;  %p2417_p2 = scmp.lt.s32.totalorder %s2415_s12, %s2408_s27 }
  0x91   : > { %p2412_p7 = pneg %p2411_p5  ;;  %p2418_p1 = por %p2417_p2, %p2416_p12 }
  0x93   : > { %p2419_p13 = pnand %p2418_p1, %p2412_p7 }
  0x95   : > { %2422 = shalt.err (!%p2419_p13)
}
  0x96   : > { %s3014_s17 = smov 8   ;;  %s3015_s29 = smov 128  }
  0x97   : > { %2114 = dma.hbm_to_vmem [thread:$0]  (!%p2771_p11), %s2767_s18, 256, %s2769_s16, %s2775_s4, %s3015_s29, %s3015_s29, %s3014_s17  }
  0x98   : > { %p3016_p9 = scmp.ne.s32.totalorder %s3007_s26, 0 }
  0x99   : > { %s2809_s30 = sand.u32 (!%p3016_p9), 1, %s2489_s19   ;;  %p3017_p0 = scmp.ne.s32.totalorder (!%p3016_p9), %s3004_s24, 0 }
  0x9a   : > { %526 = sbr.rel (%p3016_p9) target bundleno = 3099 (0xc1b), region = 80  ;;  %s1873_s9 = sshll.u32 (!%p3016_p9), %s2809_s30, 4 }
  0x9b   : > { %s529_s13 = scalar_lea.sflag (!%p3016_p9), [#allocation3], %s2809_s30  ;;  %s2813_s27 = scalar_lea.vmem (!%p3016_p9), [#allocation2], %s1873_s9 }
  0xa1   : > { %2468 = dma.done.wait (%p3017_p0), %s529_s13, 256  }
  0xa2   : > { %2470 = vsyncadd (%p3017_p0), %s529_s13, 4294967040  ;;  %p3018_p11 = scmp.eq.s32.totalorder %s2616_s22, 0 }
  0xa4   : > { %2472 = dma.done.wait (%p3018_p11), [#allocation6], 4096   ;;  %p3019_p4 = pmov %p3018_p11 }
  0xa6   : > { %2474 = vsyncadd (%p3019_p4), [#allocation6], 4294963200  ;;  %p3020_p8 = pmov %p3019_p4 }
  0xa7   : > { %p3021_p6 = pmov %p3019_p4 }
  0xa8   : > { %2476 = dma.done.wait (%p3020_p8), [#allocation9], 4096  }
  0xa9   : > { %2478 = vsyncadd (%p3021_p6), [#allocation9], 4294963200  ;;  %v2510_v0 = vmov 0   ;;  %v2511_v1 = vmov 0.0   ;;  %v2175_v2 = vld [vmem:[#allocation5 + $0x4] ss:$12 sps:$4 sm:$0xff]  }
  0xaa   : > { %810 = vmatprep.mubr.bf16.mxu0 %v2510_v0  ;;  %2006 = vmatprep.subr.bf16.mxu1 %v2511_v1  ;;  %v2177_v3 = vld [vmem:[#allocation5] ss:$12 sps:$4 sm:$0xff]   ;;  %v2178_v4 = vld [vmem:[#allocation5 + $0x1c] ss:$12 sps:$4 sm:$0xff]   ;;  %v2180_v5 = vld [vmem:[#allocation5 + $0x18] ss:$12 sps:$4 sm:$0xff]  }
  0xab   : > { %778 = vmatprep.subr.bf16.mxu0 %v2175_v2  ;;  %v2181_v6 = vld [vmem:[#allocation5 + $0x34] ss:$12 sps:$4 sm:$0xff]   ;;  %v2183_v7 = vld [vmem:[#allocation5 + $0x30] ss:$12 sps:$4 sm:$0xff]   ;;  %v2184_v8 = vld [vmem:[#allocation5 + $0x4c] ss:$12 sps:$4 sm:$0xff]  }
  0xac   : > { %779 = vmatpush1.bf16.msra.mxu0 %v2177_v3  ;;  %v2186_v9 = vld [vmem:[#allocation5 + $0x48] ss:$12 sps:$4 sm:$0xff]   ;;  %v2187_v10 = vld [vmem:[#allocation5 + $0x64] ss:$12 sps:$4 sm:$0xff]   ;;  %v2200_v12 = vld [vmem:[#allocation5 + $0x20] ss:$12 sps:$4 sm:$0xff]  }
  0xad   : > { %780 = vmatprep.subr.bf16.mxu0 %v2178_v4  ;;  %v2199_v11 = vld [vmem:[#allocation5 + $0x8] ss:$12 sps:$4 sm:$0xff]   ;;  %v2189_v13 = vld [vmem:[#allocation5 + $0x60] ss:$12 sps:$4 sm:$0xff]   ;;  %v2192_v15 = vld [vmem:[#allocation5 + $0x78] ss:$12 sps:$4 sm:$0xff]  }
  0xae   : > { %2007 = vmatpush3.bf16.msra.mxu1 %v2199_v11  ;;  %v2190_v14 = vld [vmem:[#allocation5 + $0x7c] ss:$12 sps:$4 sm:$0xff]   ;;  %v2201_v16 = vld [vmem:[#allocation5 + $0x38] ss:$12 sps:$4 sm:$0xff]   ;;  %v2193_v17 = vld [vmem:[#allocation5 + $0x94] ss:$12 sps:$4 sm:$0xff]  }
  0xaf   : > { %2008 = vmatprep.subr.bf16.mxu1 %v2511_v1  ;;  %v2202_v18 = vld [vmem:[#allocation5 + $0x50] ss:$12 sps:$4 sm:$0xff]   ;;  %v2196_v20 = vld [vmem:[#allocation5 + $0xac] ss:$12 sps:$4 sm:$0xff]   ;;  %v2203_v21 = vld [vmem:[#allocation5 + $0x68] ss:$12 sps:$4 sm:$0xff]  }
  0xb0   : > { %781 = vmatpush1.bf16.msra.mxu0 %v2180_v5  ;;  %v2195_v19 = vld [vmem:[#allocation5 + $0x90] ss:$12 sps:$4 sm:$0xff]   ;;  %v2198_v22 = vld [vmem:[#allocation5 + $0xa8] ss:$12 sps:$4 sm:$0xff]   ;;  %v2204_v25 = vld [vmem:[#allocation5 + $0x80] ss:$12 sps:$4 sm:$0xff]  }
  0xb1   : > { %782 = vmatprep.subr.bf16.mxu0 %v2181_v6  ;;  %v2833_v23 = vld [vmem:[%s2813_s27] sm:$0xff]  ;;  %v2836_v24 = vld [vmem:[%s2813_s27 + $0x8] sm:$0xff]  ;;  %vm2512_vm0 = vmmov 0   ;;  %p605_p3 = scmp.lt.s32.totalorder %s2616_s22, 1  ;;  %vm916_vm1 = vcmask 130048   ;;  %s3023_s23 = sld [smem:[#allocation22_spill]] }
  0xb2   : > { %2009 = vmatpush3.bf16.msra.mxu1 %v2200_v12  ;;  %v617_v26 = vpack.c.bf16 %v2836_v24, %v2833_v23  ;;  %v2205_v27 = vld [vmem:[#allocation5 + $0x98] ss:$12 sps:$4 sm:$0xff]   ;;  %v2206_v28 = vld [vmem:[#allocation5 + $0xb0] ss:$12 sps:$4 sm:$0xff]   ;;  %2022 = vmatprep.mubr.msk.bf16.mxu1 %vm2512_vm0, %v2511_v1  ;;  %v865_v42 = vld [vmem:[%s2986_s14 + $0x8] sm:$0xff]  ;;  %s3024_s17 = sld [smem:[#allocation23_spill]] }
  0xb3   : > { %2010 = vmatprep.subr.bf16.mxu1 %v2511_v1  ;;  %s2857_s24 = scalar_select %p605_p3, %s2616_s22, 1  ;;  %v864_v40 = vld [vmem:[%s2986_s14] sm:$0xff]  ;;  %v2208_v2 = vld [vmem:[#allocation7 + $0x8] sm:$0xff]   ;;  %v2209_v3 = vld [vmem:[#allocation7 + $0x10] sm:$0xff]   ;;  %vm1616_vm2 = vcmask 122880   ;;  %vm1706_vm3 = vcmask 1040384  }
  0xb4   : > { %783 = vmatpush1.bf16.msra.mxu0 %v2183_v7  ;;  %v2207_v63 = vld [vmem:[#allocation7] sm:$0xff]   ;;  %v2210_v4 = vld [vmem:[#allocation7 + $0x18] sm:$0xff]   ;;  %v2212_v6 = vld [vmem:[#allocation7 + $0x28] sm:$0xff]   ;;  %s3025_s13 = sld [smem:[#allocation19_spill]]  ;;  %vm1708_vm4 = vcmask 1041408   ;;  %s1952_s4 = sshll.u32 %s2616_s22, 7 }
  0xb5   : > { %784 = vmatprep.subr.bf16.mxu0 %v2184_v8  ;;  %s607_s16 = scalar_lea.vmem %s2973_s1, %s2857_s24  ;;  %v2211_v5 = vld [vmem:[#allocation7 + $0x20] sm:$0xff]   ;;  %v2213_v7 = vld [vmem:[#allocation7 + $0x30] sm:$0xff]   ;;  %vm1710_vm5 = vcmask 1042432   ;;  %s3027_s29 = sld [smem:[#allocation24_spill]] }
  0xb6   : > { %2011 = vmatpush3.bf16.msra.mxu1 %v2201_v16  ;;  %v1903_v43 = vld [vmem:[%s607_s16] ss:$0 sm:$0xff]  ;;  %s3022_s16 = sld [smem:[#allocation21_spill]]  ;;  %s1714_s22 = scalar_lea.sflag [#allocation4], %s2809_s30 }
  0xb7   : > { %2012 = vmatprep.subr.bf16.mxu1 %v2511_v1 }
  0xb8   : > { %785 = vmatpush1.bf16.msra.mxu0 %v2186_v9 }
  0xb9   : > { %786 = vmatprep.subr.bf16.mxu0 %v2187_v10 }
  0xba   : > { %2013 = vmatpush3.bf16.msra.mxu1 %v2202_v18  ;;  %s613_s27 = scalar_lea.vmem %s3025_s13, %s2857_s24 }
  0xbb   : > { %2014 = vmatprep.subr.bf16.mxu1 %v2511_v1  ;;  %s2928_s9 = scalar_lea.hbm %s3027_s29, %s1952_s4 }
  0xbc   : > { %787 = vmatpush1.bf16.msra.mxu0 %v2189_v13 }
  0xbd   : > { %788 = vmatprep.subr.bf16.mxu0 %v2190_v14 }
  0xbe   : > { %2015 = vmatpush3.bf16.msra.mxu1 %v2203_v21 }
  0xbf   : > { %2016 = vmatprep.subr.bf16.mxu1 %v2511_v1 }
  0xc0   : > { %789 = vmatpush1.bf16.msra.mxu0 %v2192_v15  ;;  %v2214_v15 = vld [vmem:[#allocation7 + $0x38] sm:$0xff]  }
  0xc1   : > { %790 = vmatprep.subr.bf16.mxu0 %v2193_v17 }
  0xc2   : > { %2017 = vmatpush3.bf16.msra.mxu1 %v2204_v25 }
  0xc3   : > { %2018 = vmatprep.subr.bf16.mxu1 %v2511_v1 }
  0xc4   : > { %791 = vmatpush1.bf16.msra.mxu0 %v2195_v19 }
  0xc5   : > { %792 = vmatprep.subr.bf16.mxu0 %v2196_v20 }
  0xc6   : > { %2019 = vmatpush3.bf16.msra.mxu1 %v2205_v27 }
  0xc7   : > { %2020 = vmatprep.subr.bf16.mxu1 %v2511_v1 }
  0xc8   : > { %793 = vmatpush1.bf16.msra.mxu0 %v2198_v22 }
  0xc9   : > { %2038 = vmatprep.subr.bf16.mxu0 %v2511_v1 }
  0xca   : > { %2021 = vmatpush3.bf16.msra.mxu1 %v2206_v28 }
  0xcb   : > { %811 = vmatmul.mubr.bf16.vlgmr.msra.gmra.mrb[0].mxu0 %v617_v26  ;;  %2026 = vmatprep.subr.bf16.mxu1 %v2511_v1 }
  0xcc   : > { %2054 = vmatprep.mubr.msk.bf16.mxu0 %vm2512_vm0, %v2511_v1  ;;  %2039 = vmatpush3.bf16.msra.mxu0 %v2207_v63 }
  0xcd   : > { %2023 = vmatmul.mubr.bf16.vlgmr.msra.gmra.mrb[0].mxu1 %v617_v26  ;;  %2040 = vmatprep.subr.bf16.mxu0 %v2511_v1 }
  0xce   : > { %2028 = vmatprep.mubr.msk.bf16.mxu1 %vm2512_vm0, %v2511_v1 }
  0xd0   : > { %2041 = vmatpush3.bf16.msra.mxu0 %v2208_v2 }
  0xd1   : > { %2042 = vmatprep.subr.bf16.mxu0 %v2511_v1 }
  0xd4   : > { %2043 = vmatpush3.bf16.msra.mxu0 %v2209_v3 }
  0xd5   : > { %2044 = vmatprep.subr.bf16.mxu0 %v2511_v1 }
  0xd8   : > { %2045 = vmatpush3.bf16.msra.mxu0 %v2210_v4 }
  0xd9   : > { %2046 = vmatprep.subr.bf16.mxu0 %v2511_v1 }
  0xdc   : > { %2047 = vmatpush3.bf16.msra.mxu0 %v2211_v5  ;;  %v2239_v5 = vld [vmem:[#allocation10 + $0x40] sm:$0xff]  }
  0xdd   : > { %2048 = vmatprep.subr.bf16.mxu0 %v2511_v1 }
  0xe0   : > { %2049 = vmatpush3.bf16.msra.mxu0 %v2212_v6  ;;  %v2240_v6 = vld [vmem:[#allocation10] sm:$0xff]  }
  0xe1   : > { %2050 = vmatprep.subr.bf16.mxu0 %v2511_v1 }
  0xe4   : > { %2051 = vmatpush3.bf16.msra.mxu0 %v2213_v7  ;;  %v2241_v7 = vld [vmem:[#allocation10 + $0x48] sm:$0xff]  }
  0xe5   : > { %2052 = vmatprep.subr.bf16.mxu0 %v2511_v1 }
  0xe8   : > { %2053 = vmatpush3.bf16.msra.mxu0 %v2214_v15  ;;  %v2249_v15 = vld [vmem:[#allocation10 + $0x68] sm:$0xff]  }
  0xe9   : > { %1978 = vmatprep.subr.bf16.mxu0 %v2239_v5 }
 0x19e   : > { %v812_v29 = vpop.f32.mrb[0].mxu0 }
 0x19f   : > { %v814_v30 = vpop.f32.mrb[1].mxu0 }
 0x1a0   : > { %v816_v31 = vpop.f32.mrb[2].mxu0  ;;  %v855_v35 = vpop.f32.mrb[0].mxu1 }
 0x1a1   : > { %v862_v32 = vpack.c.bf16 %v816_v31, %v812_v29  ;;  %v818_v33 = vpop.f32.mrb[3].mxu0  ;;  %v2024_v36 = vpop.f32.mrb[1].mxu1  ;;  %v2215_v29 = vld [vmem:[#allocation8] ss:$8 sps:$4 sm:$0xff]   ;;  %v2218_v31 = vld [vmem:[#allocation8 + $0x10] ss:$8 sps:$4 sm:$0xff]  }
 0x1a2   : > { %v863_v34 = vpack.c.bf16 %v818_v33, %v814_v30  ;;  %v858_v37 = vpop.f32.mrb[2].mxu1  ;;  %v2220_v30 = vld [vmem:[#allocation8 + $0x14] ss:$8 sps:$4 sm:$0xff]  }
 0x1a3   : > { %v940_v38 = vpack.c.bf16 %v858_v37, %v855_v35  ;;  %v2025_v39 = vpop.f32.mrb[3].mxu1 }
 0x1a4   : > { %2027 = vmatpush3.bf16.xpose.msra.mxu1 %v863_v34  ;;  %v2221_v39 = vld [vmem:[#allocation8 + $0x20] ss:$8 sps:$4 sm:$0xff]  }
 0x1a5   : > { %2032 = vmatprep.subr.bf16.mxu1 %v2511_v1 }
 0x1ab   : > { %2029 = vmatmul.mubr.bf16.vlgmr.msra.gmra.mrb[4].mxu1 %v862_v32 }
 0x1ac   : > { %2034 = vmatprep.mubr.msk.bf16.mxu1 %vm2512_vm0, %v2511_v1  ;;  %2033 = vmatpush3.bf16.msra.mxu1 %v940_v38  ;;  %v2223_v38 = vld [vmem:[#allocation8 + $0x24] ss:$8 sps:$4 sm:$0xff]  }
 0x27e   : > { %v900_v41 = vpop.f32.mrb[4].mxu1 }
 0x27f   : > { %v901_v44 = vadd.f32 %v900_v41, %v864_v40  ;;  %v2030_v45 = vpop.f32.mrb[5].mxu1  ;;  %v2226_v40 = vld [vmem:[#allocation8 + $0x34] ss:$8 sps:$4 sm:$0xff]   ;;  %v2224_v41 = vld [vmem:[#allocation8 + $0x30] ss:$8 sps:$4 sm:$0xff]  }
 0x280   : > { %v903_v46 = vpop.f32.mrb[6].mxu1  ;;  %v2230_v45 = vld [vmem:[#allocation8 + $0x50] ss:$8 sps:$4 sm:$0xff]  }
 0x281   : > { %v904_v47 = vadd.f32 %v903_v46, %v865_v42  ;;  %v2031_v48 = vpop.f32.mrb[7].mxu1  ;;  %v914_v49 = vadd.f32 %v1903_v43, %v901_v44  ;;  %v2229_v42 = vld [vmem:[#allocation8 + $0x44] ss:$8 sps:$4 sm:$0xff]   ;;  %v2232_v44 = vld [vmem:[#allocation8 + $0x54] ss:$8 sps:$4 sm:$0xff]  }
 0x282   : > { %v2235_v46 = vld [vmem:[#allocation8 + $0x64] ss:$8 sps:$4 sm:$0xff]   ;;  %v2238_v48 = vld [vmem:[#allocation8 + $0x74] ss:$8 sps:$4 sm:$0xff]  }
 0x283   : > { %v917_v50 = vsel %vm916_vm1, %v914_v49, -inf  ;;  %v915_v51 = vadd.f32 %v1903_v43, %v904_v47  ;;  %v2227_v43 = vld [vmem:[#allocation8 + $0x40] ss:$8 sps:$4 sm:$0xff]  }
 0x284   : > { %918 = vmax.xlane.f32.xlu0 %v917_v50  ;;  %v2233_v47 = vld [vmem:[#allocation8 + $0x60] ss:$8 sps:$4 sm:$0xff]  }
 0x285   : > { %v920_v52 = vsel %vm916_vm1, %v915_v51, -inf }
 0x288   : > { %921 = vmax.xlane.f32.xlu0 %v920_v52 }
 0x311   : > { %v919_v53 = vpop.xlane.xlu0 %918 }
 0x312   : > { %v923_v54 = vsub.f32 %v914_v49, %v919_v53  ;;  %v2236_v49 = vld [vmem:[#allocation8 + $0x70] ss:$8 sps:$4 sm:$0xff]  }
 0x314   : > { %v925_v55 = vmul.f32 1.442695, %v923_v54 }
 0x315   : > { %v922_v56 = vpop.xlane.xlu0 %921 }
 0x316   : > { %2255 = vpow2.f32 %v925_v55  ;;  %v924_v57 = vsub.f32 %v915_v51, %v922_v56 }
 0x318   : > { %v927_v58 = vmul.f32 1.442695, %v924_v57  ;;  %v1913_v57 = vld [vmem:[%s2982_s10] ss:$0 sm:$0xff] }
 0x31a   : > { %2257 = vpow2.f32 %v927_v58 }
 0x320   : > { %v2256_v59 = vpop.eup %2255 }
 0x321   : > { %v929_v60 = vsel %vm916_vm1, %v2256_v59, 0.0 }
 0x322   : > { %930 = vadd.xlane.f32.xlu1 %v929_v60 }
 0x324   : > { %v2258_v61 = vpop.eup %2257 }
 0x325   : > { %v932_v62 = vsel %vm916_vm1, %v2258_v61, 0.0 }
 0x326   : > { %933 = vadd.xlane.f32.xlu1 %v932_v62  ;;  %v1914_v62 = vld [vmem:[%s2983_s11] ss:$0 sm:$0xff] }
 0x3af   : > { %v931_v8 = vpop.xlane.xlu1 %930 }
 0x3b0   : > { %2259 = vrcp.f32 %v931_v8  ;;  %v2242_v8 = vld [vmem:[#allocation10 + $0x8] sm:$0xff]  }
 0x3b3   : > { %v934_v9 = vpop.xlane.xlu1 %933 }
 0x3b4   : > { %2261 = vrcp.f32 %v934_v9  ;;  %v2243_v9 = vld [vmem:[#allocation10 + $0x50] sm:$0xff]  }
 0x3ba   : > { %v2260_v10 = vpop.eup %2259 }
 0x3bb   : > { %v937_v12 = vmul.f32 %v2260_v10, %v2256_v59  ;;  %v2244_v10 = vld [vmem:[#allocation10 + $0x10] sm:$0xff]  }
 0x3be   : > { %v2262_v11 = vpop.eup %2261 }
 0x3bf   : > { %v938_v13 = vmul.f32 %v2262_v11, %v2258_v61  ;;  %v2245_v11 = vld [vmem:[#allocation10 + $0x58] sm:$0xff]  }
 0x3c1   : > { %v939_v14 = vpack.c.bf16 %v938_v13, %v937_v12  ;;  %v2246_v12 = vld [vmem:[#allocation10 + $0x18] sm:$0xff]   ;;  %v2247_v13 = vld [vmem:[#allocation10 + $0x60] sm:$0xff]  }
 0x3c3   : > { %2035 = vmatmul.mubr.msk.bf16.vlgmr.msra.gmra.mrb[8].mxu1 %vm916_vm1, %v939_v14  ;;  %v2248_v14 = vld [vmem:[#allocation10 + $0x20] sm:$0xff]  }
 0x3c4   : > { %1275 = vmatprep.mubr.bf16.mxu1 %v2510_v0  ;;  %v2217_v0 = vld [vmem:[#allocation8 + $0x4] ss:$8 sps:$4 sm:$0xff]  }
 0x3c5   : > { %1243 = vmatprep.subr.bf16.mxu1 %v2217_v0 }
 0x3c6   : > { %1244 = vmatpush1.bf16.msra.mxu1 %v2215_v29 }
 0x3c7   : > { %1245 = vmatprep.subr.bf16.mxu1 %v2220_v30 }
 0x3ca   : > { %1246 = vmatpush1.bf16.msra.mxu1 %v2218_v31 }
 0x3cb   : > { %1247 = vmatprep.subr.bf16.mxu1 %v2223_v38 }
 0x3ce   : > { %1248 = vmatpush1.bf16.msra.mxu1 %v2221_v39 }
 0x3cf   : > { %1249 = vmatprep.subr.bf16.mxu1 %v2226_v40 }
 0x3d2   : > { %1250 = vmatpush1.bf16.msra.mxu1 %v2224_v41 }
 0x3d3   : > { %1251 = vmatprep.subr.bf16.mxu1 %v2229_v42 }
 0x3d6   : > { %1252 = vmatpush1.bf16.msra.mxu1 %v2227_v43 }
 0x3d7   : > { %1253 = vmatprep.subr.bf16.mxu1 %v2232_v44 }
 0x3da   : > { %1254 = vmatpush1.bf16.msra.mxu1 %v2230_v45 }
 0x3db   : > { %1255 = vmatprep.subr.bf16.mxu1 %v2235_v46 }
 0x3de   : > { %1256 = vmatpush1.bf16.msra.mxu1 %v2233_v47 }
 0x3df   : > { %1257 = vmatprep.subr.bf16.mxu1 %v2238_v48 }
 0x3e2   : > { %1258 = vmatpush1.bf16.msra.mxu1 %v2236_v49 }
 0x496   : > { %v978_v16 = vpop.f32.mrb[8].mxu1 }
 0x497   : > { %v2036_v17 = vpop.f32.mrb[9].mxu1 }
 0x498   : > { %v981_v18 = vpop.f32.mrb[10].mxu1  ;;  %v2251_v17 = vld [vmem:[#allocation10 + $0x70] sm:$0xff]  }
 0x499   : > { %v985_v19 = vpack.c.bf16 %v981_v18, %v978_v16  ;;  %v2037_v20 = vpop.f32.mrb[11].mxu1  ;;  %v2250_v16 = vld [vmem:[#allocation10 + $0x28] sm:$0xff]   ;;  %v2252_v18 = vld [vmem:[#allocation10 + $0x30] sm:$0xff]  }
 0x49a   : > { %v2254_v20 = vld [vmem:[#allocation10 + $0x38] sm:$0xff]  }
 0x49b   : > { %2055 = vmatmul.mubr.bf16.vlgmr.msra.gmra.mrb[4].mxu0 %v985_v19  ;;  %v2253_v19 = vld [vmem:[#allocation10 + $0x78] sm:$0xff]  }
 0x49c   : > { %1979 = vmatpush3.bf16.msra.mxu0 %v2240_v6 }
 0x49d   : > { %1980 = vmatprep.subr.bf16.mxu0 %v2241_v7 }
 0x4a0   : > { %1981 = vmatpush3.bf16.msra.mxu0 %v2242_v8 }
 0x4a1   : > { %1982 = vmatprep.subr.bf16.mxu0 %v2243_v9 }
 0x4a4   : > { %1983 = vmatpush3.bf16.msra.mxu0 %v2244_v10 }
 0x4a5   : > { %1984 = vmatprep.subr.bf16.mxu0 %v2245_v11 }
 0x4a8   : > { %1985 = vmatpush3.bf16.msra.mxu0 %v2246_v12 }
 0x4a9   : > { %1986 = vmatprep.subr.bf16.mxu0 %v2247_v13 }
 0x4ac   : > { %1987 = vmatpush3.bf16.msra.mxu0 %v2248_v14  ;;  %v1931_v14 = vld [vmem:[%s3022_s16] ss:$0 sm:$0xff]  ;;  %s3026_s16 = sld [smem:[#allocation18_spill]] }
 0x4ad   : > { %1988 = vmatprep.subr.bf16.mxu0 %v2249_v15 }
 0x4b0   : > { %1989 = vmatpush3.bf16.msra.mxu0 %v2250_v16 }
 0x4b1   : > { %1990 = vmatprep.subr.bf16.mxu0 %v2251_v17 }
 0x4b2   : > { %s610_s2 = scalar_lea.vmem %s3026_s16, %s2857_s24  ;;  %s1878_s24 = sshll.u32 %s2809_s30, 3 }
 0x4b4   : > { %1991 = vmatpush3.bf16.msra.mxu0 %v2252_v18 }
 0x4b5   : > { %1992 = vmatprep.subr.bf16.mxu0 %v2253_v19 }
 0x4b8   : > { %1993 = vmatpush3.bf16.msra.mxu0 %v2254_v20 }
 0x56e   : > { %v1084_v21 = vpop.f32.mrb[4].mxu0 }
 0x56f   : > { %v1091_v22 = vadd.f32 %v1084_v21, %v2833_v23  ;;  %v2056_v25 = vpop.f32.mrb[5].mxu0  ;;  %v1153_v21 = vlaneseq }
 0x570   : > { %v1087_v26 = vpop.f32.mrb[6].mxu0 }
 0x571   : > { %v1092_v27 = vadd.f32 %v1087_v26, %v2836_v24  ;;  %1095 = vadd.xlane.f32.xlu0 %v1091_v22  ;;  %v2057_v28 = vpop.f32.mrb[7].mxu0  ;;  %v1151_v26 = vld [vmem:[%s2979_s7] sm:$0x3] }
 0x573   : > { %1097 = vadd.xlane.f32.xlu1 %v1092_v27 }
 0x5fe   : > { %v1096_v32 = vpop.xlane.xlu0 %1095 }
 0x5ff   : > { %v1100_v33 = vmul.f32 0.0078125, %v1096_v32 }
 0x600   : > { %v1098_v34 = vpop.xlane.xlu1 %1097 }
 0x601   : > { %v1102_v35 = vsub.f32 %v1091_v22, %v1100_v33  ;;  %v1101_v23 = vmul.f32 0.0078125, %v1098_v34  ;;  %v1154_v22 = vshrl.u32 %v1153_v21, 7 }
 0x603   : > { %v1103_v36 = vsub.f32 %v1092_v27, %v1101_v23  ;;  %v1104_v37 = vmul.f32 %v1102_v35, %v1102_v35  ;;  %v1155_v25 = vsub.s32 0, %v1154_v22  ;;  %v1159_v27 = vsub.s32 1, %v1154_v22 }
 0x605   : > { %1106 = vadd.xlane.f32.xlu0 %v1104_v37  ;;  %v1105_v24 = vmul.f32 %v1103_v36, %v1103_v36  ;;  %v1156_v28 = vrot.slane %v1151_v26, %v1155_v25  ;;  %v1160_v29 = vrot.slane %v1151_v26, %v1159_v27 }
 0x607   : > { %1108 = vadd.xlane.f32.xlu1 %v1105_v24 }
 0x692   : > { %v1107_v50 = vpop.xlane.xlu0 %1106 }
 0x693   : > { %v1110_v51 = vmul.f32 0.0078125, %v1107_v50 }
 0x694   : > { %v1109_v52 = vpop.xlane.xlu1 %1108 }
 0x695   : > { %v1112_v53 = vadd.f32 1e-12, %v1110_v51  ;;  %v1111_v54 = vmul.f32 0.0078125, %v1109_v52 }
 0x697   : > { %2263 = vrsqrt.f32 %v1112_v53  ;;  %v1113_v55 = vadd.f32 1e-12, %v1111_v54 }
 0x699   : > { %2265 = vrsqrt.f32 %v1113_v55 }
 0x6a1   : > { %v2264_v56 = vpop.eup %2263 }
 0x6a2   : > { %v1116_v58 = vmul.f32 %v2264_v56, %v1102_v35 }
 0x6a3   : > { %v2266_v59 = vpop.eup %2265 }
 0x6a4   : > { %v1117_v60 = vmul.f32 %v2266_v59, %v1103_v36  ;;  %v1124_v61 = vmul.f32 %v1913_v57, %v1116_v58 }
 0x6a6   : > { %v1125_v63 = vmul.f32 %v1913_v57, %v1117_v60  ;;  %v2890_v2 = vadd.f32 %v1914_v62, %v1124_v61 }
 0x6a8   : > { %v2892_v3 = vadd.f32 %v1914_v62, %v1125_v63 }
 0x6aa   : > { %v1134_v4 = vpack.c.bf16 %v2892_v3, %v2890_v2 }
 0x6ac   : > { %1276 = vmatmul.mubr.bf16.vlgmr.msra.gmra.mrb[12].mxu1 %v1134_v4 }
 0x6ad   : > { %2062 = vmatprep.mubr.msk.f32.mxu1 %vm2512_vm0, %v2511_v1 }
 0x77f   : > { %v1277_v0 = vpop.f32.mrb[12].mxu1 }
 0x780   : > { %v1278_v30 = vadd.f32 %v1277_v0, %v1156_v28  ;;  %v1279_v31 = vpop.f32.mrb[13].mxu1 }
 0x781   : > { %v1280_v32 = vadd.f32 %v1279_v31, %v1160_v29  ;;  %v1281_v33 = vpop.f32.mrb[14].mxu1 }
 0x782   : > { %v1286_v34 = vmul.f32 %v1278_v30, %v1278_v30  ;;  %v1282_v35 = vadd.f32 %v1281_v33, %v1156_v28  ;;  %v1283_v23 = vpop.f32.mrb[15].mxu1  ;;  %v2513_v33 = vmov 0.0|0.0  }
 0x783   : > { %v1287_v36 = vmul.f32 %v1280_v32, %v1280_v32  ;;  %v1284_v37 = vadd.f32 %v1283_v23, %v1160_v29  ;;  %2072 = vmatprep.subr.bf16.mxu1 %v2513_v33 }
 0x784   : > { %v1290_v24 = vmul.f32 %v1286_v34, %v1278_v30  ;;  %v1288_v38 = vmul.f32 %v1282_v35, %v1282_v35 }
 0x785   : > { %v1291_v39 = vmul.f32 %v1287_v36, %v1280_v32  ;;  %v1289_v40 = vmul.f32 %v1284_v37, %v1284_v37 }
 0x786   : > { %v1294_v41 = vmul.f32 0.044715, %v1290_v24  ;;  %v1292_v42 = vmul.f32 %v1288_v38, %v1282_v35  ;;  %v1948_v24 = vld [vmem:[%s3023_s23] ss:$0 sm:$0xff]  ;;  %s603_s23 = scalar_lea.vmem [#allocation11], %s1878_s24 }
 0x787   : > { %v1295_v43 = vmul.f32 0.044715, %v1291_v39  ;;  %v1293_v44 = vmul.f32 %v1289_v40, %v1284_v37  ;;  %s1727_s28 = sshll.u32 %s603_s23, 4  ;;  %s2930_s28 = int_to_ptr.vmem [resolvable:$true] %s1727_s28 }
 0x788   : > { %v1298_v45 = vadd.f32 %v1294_v41, %v1278_v30  ;;  %v1296_v46 = vmul.f32 0.044715, %v1292_v42  ;;  %v1949_v42 = vld [vmem:[%s3024_s17] ss:$0 sm:$0xff]  ;;  %s2423_s13 = scalar_lea.vmem %s2930_s28, 128 }
 0x789   : > { %v1299_v47 = vadd.f32 %v1295_v43, %v1280_v32  ;;  %v1297_v48 = vmul.f32 0.044715, %v1293_v44  ;;  %p2424_p5 = scmp.ne.s32.totalorder %s2930_s28, %s2423_s13 }
 0x78a   : > { %v1302_v49 = vmul.f32 0.7978846, %v1298_v45  ;;  %v1300_v50 = vadd.f32 %v1296_v46, %v1282_v35 }
 0x78b   : > { %v1303_v51 = vmul.f32 0.7978846, %v1299_v47  ;;  %v1301_v52 = vadd.f32 %v1297_v48, %v1284_v37  ;;  %v1542_v47 = vld [vmem:[%s613_s27] sm:$0x1]  ;;  %p2425_p7 = pnand %p2424_p5, %p2754_p10  ;;  %s2514_s27 = smov [#allocation11]  }
 0x78c   : > { %2267 = vtanh.f32 %v1302_v49  ;;  %v1304_v53 = vmul.f32 0.7978846, %v1300_v50  ;;  %v1543_v48 = vld [vmem:[%s610_s2] sm:$0x1]  ;;  %s2427_s26 = sshll.u32 %s2514_s27, 4  ;;  %s2428_s26 = int_to_ptr.vmem [resolvable:$false] %s2427_s26 }
 0x78d   : > { %2269 = vtanh.f32 %v1303_v51  ;;  %v1305_v54 = vmul.f32 0.7978846, %v1301_v52  ;;  %v1544_v49 = vsub.f32 1.0, %v1543_v48  ;;  %p2426_p12 = pneg %p2425_p7  ;;  %s2429_s18 = scalar_lea.vmem %s2428_s26, 256 }
 0x78e   : > { %2271 = vtanh.f32 %v1304_v53  ;;  %p2430_p2 = scmp.lt.s32.totalorder %s2930_s28, %s2428_s26  ;;  %p2431_p1 = scmp.lt.s32.totalorder %s2429_s18, %s2423_s13 }
 0x78f   : > { %2273 = vtanh.f32 %v1305_v54  ;;  %v1545_v50 = vmul.f32 -1e+09, %v1544_v49 }
 0x790   : > { %p2432_p13 = por %p2431_p1, %p2430_p2 }
 0x792   : > { %p2433_p9 = pnand %p2432_p13, %p2426_p12 }
 0x796   : > { %v2268_v55 = vpop.eup %2267 }
 0x797   : > { %v2270_v56 = vpop.eup %2269  ;;  %v1310_v57 = vadd.f32 1.0, %v2268_v55 }
 0x798   : > { %v2272_v58 = vpop.eup %2271  ;;  %v1311_v59 = vadd.f32 1.0, %v2270_v56 }
 0x799   : > { %v2274_v60 = vpop.eup %2273  ;;  %v1314_v61 = vmul.f32 0.5, %v1310_v57  ;;  %v1312_v62 = vadd.f32 1.0, %v2272_v58 }
 0x79a   : > { %v1313_v63 = vadd.f32 1.0, %v2274_v60  ;;  %v1315_v4 = vmul.f32 0.5, %v1311_v59 }
 0x79b   : > { %v1316_v5 = vmul.f32 0.5, %v1312_v62  ;;  %v1318_v7 = vmul.f32 %v1314_v61, %v1278_v30 }
 0x79c   : > { %v1317_v6 = vmul.f32 0.5, %v1313_v63  ;;  %v1319_v9 = vmul.f32 %v1315_v4, %v1280_v32 }
 0x79d   : > { %v1320_v8 = vmul.f32 %v1316_v5, %v1282_v35 }
 0x79e   : > { %v1321_v10 = vmul.f32 %v1317_v6, %v1284_v37 }
 0x79f   : > { %v1322_v11 = vpack.c.bf16 %v1320_v8, %v1318_v7 }
 0x7a0   : > { %v1323_v12 = vpack.c.bf16 %v1321_v10, %v1319_v9 }
 0x7a2   : > { %1491 = vmatprep.mubr.bf16.mxu0 %v1323_v12 }
 0x7a3   : > { %1492 = vmatmul.mubr.bf16.vlgmr.msra.gmra.mrb[8].mxu0 %v1322_v11 }
 0x876   : > { %v1994_v13 = vpop.f32.mrb[8].mxu0 }
 0x877   : > { %v1995_v15 = vpop.f32.mrb[9].mxu0 }
 0x878   : > { %v1996_v16 = vadd.f32 %v1995_v15, %v1994_v13  ;;  %v1997_v17 = vpop.f32.mrb[10].mxu0 }
 0x879   : > { %v1998_v18 = vpop.f32.mrb[11].mxu0 }
 0x87a   : > { %v1494_v19 = vadd.f32 %v1996_v16, %v1931_v14  ;;  %v1999_v20 = vadd.f32 %v1998_v18, %v1997_v17 }
 0x87c   : > { %v1497_v21 = vadd.f32 %v1999_v20, %v1931_v14  ;;  %v1500_v22 = vadd.f32 %v1494_v19, %v2890_v2 }
 0x87e   : > { %1504 = vadd.xlane.f32.xlu0 %v1500_v22  ;;  %v1501_v25 = vadd.f32 %v1497_v21, %v2892_v3 }
 0x880   : > { %1506 = vadd.xlane.f32.xlu1 %v1501_v25 }
 0x90b   : > { %v1505_v26 = vpop.xlane.xlu0 %1504 }
 0x90c   : > { %v1508_v27 = vmul.f32 0.0078125, %v1505_v26 }
 0x90d   : > { %v1507_v28 = vpop.xlane.xlu1 %1506 }
 0x90e   : > { %v1510_v29 = vsub.f32 %v1500_v22, %v1508_v27  ;;  %v1509_v0 = vmul.f32 0.0078125, %v1507_v28 }
 0x910   : > { %v1511_v30 = vsub.f32 %v1501_v25, %v1509_v0  ;;  %v1512_v31 = vmul.f32 %v1510_v29, %v1510_v29 }
 0x912   : > { %1514 = vadd.xlane.f32.xlu0 %v1512_v31  ;;  %v1513_v32 = vmul.f32 %v1511_v30, %v1511_v30 }
 0x914   : > { %1516 = vadd.xlane.f32.xlu1 %v1513_v32 }
 0x99f   : > { %v1515_v34 = vpop.xlane.xlu0 %1514 }
 0x9a0   : > { %v1518_v35 = vmul.f32 0.0078125, %v1515_v34 }
 0x9a1   : > { %v1517_v23 = vpop.xlane.xlu1 %1516 }
 0x9a2   : > { %v1520_v2 = vadd.f32 1e-12, %v1518_v35  ;;  %v1519_v36 = vmul.f32 0.0078125, %v1517_v23 }
 0x9a4   : > { %2275 = vrsqrt.f32 %v1520_v2  ;;  %v1521_v3 = vadd.f32 1e-12, %v1519_v36 }
 0x9a6   : > { %2277 = vrsqrt.f32 %v1521_v3 }
 0x9ae   : > { %v2276_v37 = vpop.eup %2275 }
 0x9af   : > { %v1524_v38 = vmul.f32 %v2276_v37, %v1510_v29 }
 0x9b0   : > { %v2278_v39 = vpop.eup %2277 }
 0x9b1   : > { %v1525_v40 = vmul.f32 %v2278_v39, %v1511_v30  ;;  %v1532_v41 = vmul.f32 %v1948_v24, %v1524_v38 }
 0x9b3   : > { %v1533_v43 = vmul.f32 %v1948_v24, %v1525_v40  ;;  %v1540_v44 = vadd.f32 %v1949_v42, %v1532_v41 }
 0x9b5   : > { %v1541_v45 = vadd.f32 %v1949_v42, %v1533_v43 }
 0x9b7   : > { %v2073_v46 = vpack.c.bf16 %v1541_v45, %v1540_v44 }
 0x9b9   : > { %2074 = vmatpush3.bf16.xpose.msra.mxu1 %v2073_v46 }
 0x9ba   : > { %2075 = vmatprep.subr.bf16.mxu1 %v2513_v33 }
 0x9c0   : > { %2063 = vmatmul.mubr.f32.vlgmr.msra.gmra.mrb[16].mxu1 %v1542_v47 }
 0x9c1   : > { %2077 = vmatpush3.bf16.msra.mxu1 %v2073_v46  ;;  %2069 = vmatprep.mubr.msk.f32.mxu1 %vm2512_vm0, %v2511_v1 }
 0xa93   : > { %v1612_v51 = vpop.f32.mrb[16].mxu1 }
 0xa94   : > { %v1613_v52 = vadd.f32 %v1612_v51, %v1545_v50  ;;  %v2064_v53 = vpop.f32.mrb[17].mxu1 }
 0xa96   : > { %v1617_v54 = vsel %vm1616_vm2, %v1613_v52, -inf }
 0xa97   : > { %1618 = vmax.xlane.f32.xlu0 %v1617_v54 }
 0xb24   : > { %v1619_v55 = vpop.xlane.xlu0 %1618 }
 0xb25   : > { %v1620_v56 = vsub.f32 %v1613_v52, %v1619_v55  ;;  %v1701_v61 = vrot.slane %v1619_v55, 7 }
 0xb27   : > { %v1621_v57 = vmul.f32 1.442695, %v1620_v56 }
 0xb29   : > { %2279 = vpow2.f32 %v1621_v57 }
 0xb33   : > { %v2280_v1 = vpop.eup %2279 }
 0xb34   : > { %v1623_v58 = vsel %vm1616_vm2, %v2280_v1, 0.0  ;;  %v1626_v59 = vmul.f32 %v2280_v1, %v1543_v48 }
 0xb35   : > { %1624 = vadd.xlane.f32.xlu1 %v1623_v58 }
 0xb36   : > { %2070 = vmatmul.mubr.msk.f32.vlgmr.msra.gmra.mrb[18].mxu1 %vm916_vm1, %v1626_v59 }
 0xbc2   : > { %v1625_v60 = vpop.xlane.xlu1 %1624 }
 0xbc3   : > { %v1704_v62 = vrot.slane %v1625_v60, 6 }
 0xc09   : > { %v1696_v63 = vpop.f32.mrb[18].mxu1 }
 0xc0a   : > { %v1707_v4 = vsel %vm1706_vm3, %v1696_v63, %v1701_v61  ;;  %v2071_v5 = vpop.f32.mrb[19].mxu1 }
 0xc0b   : > { %v1709_v6 = vsel %vm1708_vm4, %v1707_v4, %v1704_v62 }
 0xc0c   : > { %v1711_v7 = vsel %vm1710_vm5, %v1709_v6, 0.0 }
 0xc0d   : > { %1712 = vst [vmem:[%s603_s23] sm:$0xff] %v1711_v7 }
 0xc0e   : > { %2436 = shalt.err (!%p2433_p9)
}
 0xc0f   : > { %s2437_s30 = scalar_lea.hbm %s2928_s9, 128  ;;  %s2441_s24 = scalar_lea.hbm %s3027_s29, 256 }
 0xc10   : > { %p2438_p0 = scmp.ne.s32.totalorder %s2928_s9, %s2437_s30  ;;  %p2442_p8 = scmp.lt.u32.totalorder %s2928_s9, %s3027_s29 }
 0xc11   : > { %p2443_p6 = scmp.lt.u32.totalorder %s2441_s24, %s2437_s30  ;;  %p2445_p5 = scmp.lt.u32.totalorder %s2437_s30, %s2928_s9 }
 0xc12   : > { %p2439_p11 = pnand %p2438_p0, %p2754_p10 }
 0xc13   : > { %p2444_p3 = por %p2443_p6, %p2442_p8 }
 0xc14   : > { %p2440_p4 = pneg %p2439_p11 }
 0xc15   : > { %p2446_p7 = por %p2445_p5, %p2444_p3 }
 0xc17   : > { %p2447_p12 = pnand %p2446_p7, %p2440_p4 }
 0xc19   : > { %2450 = shalt.err (!%p2447_p12)
}
 0xc1a   : > { %2096 = dma.vmem_to_hbm [thread:$0]  (%p2754_p10), %s2930_s28, 128, %s2928_s9, %s1714_s22  }
 0xc1b PF: > { %s3028_s12 = sld [smem:[#allocation16_spill]]  ;;  %s3029_s17 = sld [smem:[#allocation17_spill]] }
 0xc1c   : > { %p3031_p1 = scmp.ge.s32.totalorder %s2497_s21, 2 }
 0xc21   : > { %s1739_s13 = sand.u32 1, %s3028_s12   ;;  %p3030_p2 = scmp.ne.s32.totalorder %s3029_s17, 0 }
 0xc22   : > { %s1740_s27 = scalar_lea.sflag [#allocation4], %s1739_s13 }
 0xc23   : > { %p2116_p13 = pnand %p3031_p1, %p3030_p2 }
 0xc25   : > { %2480 = dma.done.wait (!%p2116_p13), %s1740_s27, 128  }
 0xc26   : > { %2482 = vsyncadd (!%p2116_p13), %s1740_s27, 4294967168  ;;  %p30_p9 = scmp.ge.s32.totalorder %s2744_s15, 4   ;;  %s3032_s18 = smov %s2489_s19 }
 0xc27   : > { %s3033_s19 = smov %s2493_s20  ;;  %s3034_s20 = smov %s2760_s25 }
 0xc28   : > { %s3035_s21 = smov %s2744_s15  ;;  %32 = sbr.rel (!%p30_p9) target bundleno = 15 (0xf), region = 150 }
 0xc2f   :  { %1745 = vsyncpa [#allocation3], 1 }
 0xc30   :  { %1747 = vsyncpa [#allocation3 + $0x1], 1 }
 0xc31   :  { %1748 = vsyncpa [#allocation6], 1 }
 0xc32   :  { %1749 = vsyncpa [#allocation9], 1 }
 0xc33   :  { %1750 = vsyncpa [#allocation4], 1 }
 0xc34   :  { %1752 = vsyncpa [#allocation4 + $0x1], 1 }

</bundles_post_ra>
